<compile_context>
chip_gen: v5e
topology: v5e:2x2
jax: 0.10.0
libtpu: 0.0.40
codegen_flags: <defaults>
</compile_context>

<pallas_src>
import functools
import math

import jax
import jax.numpy as jnp
from jax import lax
from jax.experimental import pallas as pl
from jax.experimental.pallas import tpu as pltpu


# --------------------------------------------------------------------------- #
# small helpers
# --------------------------------------------------------------------------- #

def _round_up(x, m):
    return ((x + m - 1) // m) * m


def _clamp_vmem(est_bytes):
    # Raise v5e's 16 MiB scoped default; stay comfortably under v7x's 64 MiB.
    return int(min(max(est_bytes + (2 << 20), 32 << 20), 48 << 20))


def _tile_and_pad(dim, pref):
    """Tile is always <= pref; pad dim up to a tile multiple when needed.

    Full-extent blocks (dim <= pref) are exempt from the (8,128) constraint."""
    if dim <= pref:
        return dim, dim
    if dim % pref == 0:
        return pref, dim
    return pref, _round_up(dim, pref)


def _pick_chunk(seq_len, pref):
    """Largest chunk <= pref that divides seq_len and is a multiple of 8
    (or the full sequence), so the (1, C, 3D) block always satisfies the
    (8,128) / full-extent block rule."""
    if seq_len <= pref:
        return seq_len
    c = (min(pref, seq_len) // 8) * 8
    while c >= 8:
        if seq_len % c == 0:
            return c
        c -= 8
    # TODO(synk): pad + mask the sequence tail instead of this full-length fallback.
    return seq_len


def layer_norm(x, g, b, eps=1e-5):
    # TODO(synk): fuse LN1 into the fused-QKV linear kernel (needs full-row
    # stats before the first K tile, i.e. only valid when tk == K).
    xf = x.astype(jnp.float32)
    mu = jnp.mean(xf, axis=-1, keepdims=True)
    var = jnp.mean(jnp.square(xf - mu), axis=-1, keepdims=True)
    y = (xf - mu) * lax.rsqrt(var + eps) * g.astype(jnp.float32) + b.astype(jnp.float32)
    return y.astype(x.dtype)


# --------------------------------------------------------------------------- #
# in-kernel helpers
# --------------------------------------------------------------------------- #

def _approx_recip(x):
    inv = pl.reciprocal(x, approx=True)      # EUP slot
    return inv * (2.0 - x * inv)             # one Newton step


def _softmax_rows(x):
    m = jnp.max(x, axis=-1, keepdims=True)
    e = jnp.exp(x - m)
    return e * _approx_recip(jnp.sum(e, axis=-1, keepdims=True))


def _make_mm(matmul_dtype):
    def mm(a, b, dims):
        if matmul_dtype is not None:
            a = a.astype(matmul_dtype)       # bf16 MXU operands
            b = b.astype(matmul_dtype)
        return lax.dot_general(a, b, (dims, ((), ())),
                               preferred_element_type=jnp.float32)
    return mm


def _rope_consts(cs_ref, rot_dim):
    if rot_dim <= 0:
        return None
    cos = cs_ref[:, :rot_dim].astype(jnp.float32)
    sin = cs_ref[:, rot_dim:2 * rot_dim].astype(jnp.float32)
    # Pair-swap-with-sign matrix: (x @ P)[:, 2i] = -x[:, 2i+1], [:, 2i+1] = x[:, 2i].
    pr = lax.broadcasted_iota(jnp.int32, (rot_dim, rot_dim), 0)
    pc = lax.broadcasted_iota(jnp.int32, (rot_dim, rot_dim), 1)
    perm = (jnp.where((pr % 2 == 0) & (pc == pr + 1), 1.0, 0.0)
            - jnp.where((pr % 2 == 1) & (pc == pr - 1), 1.0, 0.0)).astype(jnp.float32)
    return cos, sin, perm


def _rope_rotate(x, rope, mm, d_head, rot_dim):
    if rope is None:
        return x
    cos, sin, perm = rope
    xr = x[:, :rot_dim]
    xr = xr * cos + mm(xr, perm, ((1,), (0,))) * sin   # interleaved-pair RoPE on MXU
    if rot_dim == d_head:
        return xr
    return jnp.concatenate([xr, x[:, rot_dim:]], axis=-1)


# --------------------------------------------------------------------------- #
# tiled linear (y = x @ W + b with W pre-transposed to (K, N); fused ReLU)
# --------------------------------------------------------------------------- #

def _linear_kernel(x_ref, w_ref, b_ref, o_ref, acc_ref, *, activation, matmul_dtype):
    @pl.when(pl.program_id(2) == 0)
    def _():
        acc_ref[...] = jnp.zeros_like(acc_ref)

    a = x_ref[...]
    w = w_ref[...]
    if matmul_dtype is not None:
        a = a.astype(matmul_dtype)           # bf16 operands, f32 accumulation
        w = w.astype(matmul_dtype)
    acc_ref[...] += jnp.dot(a, w, preferred_element_type=jnp.float32)

    @pl.when(pl.program_id(2) == pl.num_programs(2) - 1)
    def _():
        y = acc_ref[...] + b_ref[...].astype(jnp.float32)
        if activation == "relu":
            y = jnp.maximum(y, 0.0)
        o_ref[...] = y.astype(o_ref.dtype)


def linear_pallas(x2d, w_kn, b=None, *, activation=None, matmul_dtype=None,
                  tm=512, tn=512, tk=512):
    m, kdim = x2d.shape
    k2, n = w_kn.shape
    assert k2 == kdim
    if b is None:
        b = jnp.zeros((n,), jnp.float32)

    tm_, mp = _tile_and_pad(m, tm)
    tn_, np_ = _tile_and_pad(n, tn)
    tk_, kp = _tile_and_pad(kdim, tk)

    xp = x2d if (mp == m and kp == kdim) else jnp.pad(x2d, ((0, mp - m), (0, kp - kdim)))
    wp = w_kn if (kp == kdim and np_ == n) else jnp.pad(w_kn, ((0, kp - kdim), (0, np_ - n)))
    bp = (b if np_ == n else jnp.pad(b, (0, np_ - n))).reshape(1, np_)

    grid = (mp // tm_, np_ // tn_, kp // tk_)
    est = 4 * (2 * tm_ * tk_ + 2 * tk_ * tn_ + 3 * tm_ * tn_)

    out = pl.pallas_call(
        functools.partial(_linear_kernel, activation=activation,
                          matmul_dtype=matmul_dtype),
        out_shape=jax.ShapeDtypeStruct((mp, np_), x2d.dtype),
        grid=grid,
        in_specs=[
            pl.BlockSpec((tm_, tk_), lambda i, j, k: (i, k)),
            pl.BlockSpec((tk_, tn_), lambda i, j, k: (k, j)),
            pl.BlockSpec((1, tn_), lambda i, j, k: (0, j)),
        ],
        out_specs=pl.BlockSpec((tm_, tn_), lambda i, j, k: (i, j)),
        scratch_shapes=[pltpu.VMEM((tm_, tn_), jnp.float32)],
        compiler_params=pltpu.CompilerParams(
            dimension_semantics=("parallel", "parallel", "arbitrary"),
            vmem_limit_bytes=_clamp_vmem(est)),
    )(xp, wp, bp)
    if mp != m or np_ != n:
        out = out[:m, :n]
    return out


# --------------------------------------------------------------------------- #
# orthogonal linear attention core (chunked, fused RoPE, augmented [KV | Kn])
# --------------------------------------------------------------------------- #

def _ortho_attn_causal_kernel(qkv_ref, cs_ref, o_ref, kv_ref, *,
                              n_heads, d_head, d_model, rot_dim, matmul_dtype):
    c = pl.program_id(1)

    @pl.when(c == 0)
    def _():
        # Per-head running augmented state: [sum_t k_t v_t^T | sum_t k_t].
        kv_ref[...] = jnp.zeros_like(kv_ref)

    chunk = qkv_ref.shape[1]
    mm = _make_mm(matmul_dtype)
    rope = _rope_consts(cs_ref, rot_dim)
    row = lax.broadcasted_iota(jnp.int32, (chunk, chunk), 0)
    col = lax.broadcasted_iota(jnp.int32, (chunk, chunk), 1)
    causal_mask = col <= row
    ones_col = jnp.ones((chunk, 1), jnp.float32)

    # TODO(synk): for large n_heads, move heads onto a grid axis (needs d_head to
    # satisfy the (8,128) last-two-dims block rule) to bound vreg live ranges and
    # feed both v7x TensorCores when batch is small; static loop kept for
    # lowering robustness at small d_head.
    head_outs = []
    for h in range(n_heads):
        lo = h * d_head
        qh = _softmax_rows(_rope_rotate(
            qkv_ref[0, :, lo:lo + d_head].astype(jnp.float32),
            rope, mm, d_head, rot_dim))
        kh = _softmax_rows(_rope_rotate(
            qkv_ref[0, :, d_model + lo:d_model + lo + d_head].astype(jnp.float32),
            rope, mm, d_head, rot_dim))
        vh = qkv_ref[0, :, 2 * d_model + lo:2 * d_model + lo + d_head].astype(jnp.float32)
        v_aug = jnp.concatenate([vh, ones_col], axis=-1)        # (C, dh+1)

        kv_prev = kv_ref[h]                                     # (dh, dh+1)
        s_loc = jnp.where(causal_mask, mm(qh, kh, ((1,), (1,))), 0.0)
        # Augmented matmuls: the last column carries the denominator (row sums
        # come out of the MXU instead of XLU reductions).
        nd = mm(s_loc, v_aug, ((1,), (0,))) + mm(qh, kv_prev, ((1,), (0,)))
        kv_ref[h] = kv_prev + mm(kh, v_aug, ((0,), (0,)))

        num = nd[:, :d_head]
        den = nd[:, d_head:d_head + 1]
        head_outs.append(num * _approx_recip(den))

    # Single lane-dense store per chunk (heads concatenated along lanes).
    o_ref[0] = jnp.concatenate(head_outs, axis=-1).astype(o_ref.dtype)


def _ortho_attn_kv_kernel(qkv_ref, cs_ref, kv_out_ref, kv_ref, *,
                          n_heads, d_head, d_model, rot_dim, matmul_dtype):
    """Non-causal pass 1: accumulate augmented [KV | Kn] per head over chunks."""
    c = pl.program_id(1)

    @pl.when(c == 0)
    def _():
        kv_ref[...] = jnp.zeros_like(kv_ref)

    chunk = qkv_ref.shape[1]
    mm = _make_mm(matmul_dtype)
    rope = _rope_consts(cs_ref, rot_dim)
    ones_col = jnp.ones((chunk, 1), jnp.float32)

    for h in range(n_heads):
        lo = h * d_head
        kh = _softmax_rows(_rope_rotate(
            qkv_ref[0, :, d_model + lo:d_model + lo + d_head].astype(jnp.float32),
            rope, mm, d_head, rot_dim))
        vh = qkv_ref[0, :, 2 * d_model + lo:2 * d_model + lo + d_head].astype(jnp.float32)
        v_aug = jnp.concatenate([vh, ones_col], axis=-1)
        kv_ref[h] = kv_ref[h] + mm(kh, v_aug, ((0,), (0,)))

    @pl.when(c == pl.num_programs(1) - 1)
    def _():
        kv_out_ref[0] = kv_ref[...]


def _ortho_attn_nc_out_kernel(qkv_ref, cs_ref, kv_ref, o_ref, *,
                              n_heads, d_head, d_model, rot_dim, matmul_dtype):
    """Non-causal pass 2: per-chunk normalized output from the global state."""
    mm = _make_mm(matmul_dtype)
    rope = _rope_consts(cs_ref, rot_dim)

    head_outs = []
    for h in range(n_heads):
        lo = h * d_head
        qh = _softmax_rows(_rope_rotate(
            qkv_ref[0, :, lo:lo + d_head].astype(jnp.float32),
            rope, mm, d_head, rot_dim))
        nd = mm(qh, kv_ref[0, h].astype(jnp.float32), ((1,), (0,)))
        num = nd[:, :d_head]
        den = nd[:, d_head:d_head + 1]
        head_outs.append(num * _approx_recip(den))

    o_ref[0] = jnp.concatenate(head_outs, axis=-1).astype(o_ref.dtype)


def ortho_attention_pallas(qkv, n_heads, rot_table, rot_dim, *, causal=True,
                           chunk=256, matmul_dtype=None):
    B, S, three_d = qkv.shape
    d_model = three_d // 3
    d_head = d_model // n_heads
    C = _pick_chunk(S, chunk)
    n_chunks = S // C
    tc = rot_table.shape[1]

    qkv_spec = pl.BlockSpec((1, C, three_d), lambda b, c: (b, c, 0))
    # TODO(synk): on v7x consider pipeline_mode=pl.Buffered(3) on qkv_spec if the
    # DMA is still exposed once activations move to bf16 storage.
    cs_spec = pl.BlockSpec((C, tc), lambda b, c: (c, 0))
    out_spec = pl.BlockSpec((1, C, d_model), lambda b, c: (b, c, 0))
    est = (4 * (2 * C * three_d + 2 * C * d_model + 2 * C * tc)
           + 4 * n_heads * d_head * (d_head + 1))
    vlim = _clamp_vmem(est)
    common = dict(n_heads=n_heads, d_head=d_head, d_model=d_model,
                  rot_dim=rot_dim, matmul_dtype=matmul_dtype)

    if causal:
        return pl.pallas_call(
            functools.partial(_ortho_attn_causal_kernel, **common),
            out_shape=jax.ShapeDtypeStruct((B, S, d_model), qkv.dtype),
            grid=(B, n_chunks),
            in_specs=[qkv_spec, cs_spec],
            out_specs=out_spec,
            scratch_shapes=[pltpu.VMEM((n_heads, d_head, d_head + 1), jnp.float32)],
            compiler_params=pltpu.CompilerParams(
                dimension_semantics=("parallel", "arbitrary"),
                vmem_limit_bytes=vlim),
        )(qkv, rot_table)

    # Non-causal: two chunked passes so the whole sequence is never resident.
    kv_shape = (B, n_heads, d_head, d_head + 1)
    kv_spec = pl.BlockSpec((1, n_heads, d_head, d_head + 1),
                           lambda b, c: (b, 0, 0, 0))
    kv = pl.pallas_call(
        functools.partial(_ortho_attn_kv_kernel, **common),
        out_shape=jax.ShapeDtypeStruct(kv_shape, jnp.float32),
        grid=(B, n_chunks),
        in_specs=[qkv_spec, cs_spec],
        out_specs=kv_spec,
        scratch_shapes=[pltpu.VMEM((n_heads, d_head, d_head + 1), jnp.float32)],
        compiler_params=pltpu.CompilerParams(
            dimension_semantics=("parallel", "arbitrary"),
            vmem_limit_bytes=vlim),
    )(qkv, rot_table)

    return pl.pallas_call(
        functools.partial(_ortho_attn_nc_out_kernel, **common),
        out_shape=jax.ShapeDtypeStruct((B, S, d_model), qkv.dtype),
        grid=(B, n_chunks),
        in_specs=[qkv_spec, cs_spec, kv_spec],
        out_specs=out_spec,
        compiler_params=pltpu.CompilerParams(
            dimension_semantics=("parallel", "parallel"),
            vmem_limit_bytes=vlim),
    )(qkv, rot_table, kv)


# --------------------------------------------------------------------------- #
# RoPE table (rotary_embedding_torch semantics: interleaved pairs, theta=10000)
# --------------------------------------------------------------------------- #

def make_rope_table(seq_len, rot_dim, theta=10000.0):
    """(S, 2*rot_dim) table laid out as [cos | sin] per position."""
    if rot_dim <= 0:
        return jnp.zeros((seq_len, 2), jnp.float32)
    inv_freq = 1.0 / (theta ** (jnp.arange(0, rot_dim, 2, dtype=jnp.float32) / rot_dim))
    ang = jnp.arange(seq_len, dtype=jnp.float32)[:, None] * inv_freq[None, :]
    ang = jnp.repeat(ang, 2, axis=-1)
    return jnp.concatenate([jnp.cos(ang), jnp.sin(ang)], axis=-1)


def apply_rope(t, n_heads, rot_dim, theta=10000.0):
    """Plain-JAX RoPE (used only by the reference implementation)."""
    if rot_dim <= 0:
        return t
    B, S, D = t.shape
    dh = D // n_heads
    th = t.reshape(B, S, n_heads, dh)
    t_rot, t_pass = th[..., :rot_dim], th[..., rot_dim:]

    inv_freq = 1.0 / (theta ** (jnp.arange(0, rot_dim, 2, dtype=jnp.float32) / rot_dim))
    ang = jnp.arange(S, dtype=jnp.float32)[:, None] * inv_freq[None, :]
    ang = jnp.repeat(ang, 2, axis=-1)
    cos = jnp.cos(ang)[None, :, None, :]
    sin = jnp.sin(ang)[None, :, None, :]

    x_even = t_rot[..., 0::2]
    x_odd = t_rot[..., 1::2]
    rot_half = jnp.stack([-x_odd, x_even], axis=-1).reshape(t_rot.shape)
    t_rot = t_rot * cos + rot_half * sin
    return jnp.concatenate([t_rot, t_pass], axis=-1).reshape(B, S, D)


# --------------------------------------------------------------------------- #
# module forward
# --------------------------------------------------------------------------- #

def ortho_linear_attention(x, lp, n_heads, rot_table, rot_dim, *, causal=True,
                           chunk=256, matmul_dtype=None):
    B, S, D = x.shape
    x2d = x.reshape(B * S, D)
    # Fused Q/K/V projection; exp(beta) is pre-folded into w_qkv/b_qkv
    # (RoPE is linear, so folding commutes with the in-kernel rotation).
    qkv = linear_pallas(x2d, lp["w_qkv"], lp["b_qkv"],
                        matmul_dtype=matmul_dtype).reshape(B, S, 3 * D)
    attn = ortho_attention_pallas(qkv, n_heads, rot_table, rot_dim,
                                  causal=causal, chunk=chunk,
                                  matmul_dtype=matmul_dtype)
    out = linear_pallas(attn.reshape(B * S, D), lp["w_o"], lp["b_o"],
                        matmul_dtype=matmul_dtype)
    return out.reshape(B, S, D)


def ortho_linear_transformer(tokens, prepped, *, n_heads, causal=True,
                             chunk=256, matmul_dtype=None):
    # dropout p = 0.0 -> identity.
    B = tokens.shape[0]
    tok = tokens.reshape(B, -1).astype(jnp.int32)
    x = prepped["embedding"][tok]             # gather stays in XLA
    B, S, D = x.shape
    rot_dim = 2 * ((D // (2 * n_heads)) // 2)
    rot_table = make_rope_table(S, rot_dim)   # shared by every layer

    for lp in prepped["layers"]:
        h = layer_norm(x, lp["ln1_g"], lp["ln1_b"])
        a = ortho_linear_attention(h, lp, n_heads, rot_table, rot_dim,
                                   causal=causal, chunk=chunk,
                                   matmul_dtype=matmul_dtype)
        x = layer_norm(h + a, lp["ln2_g"], lp["ln2_b"])
        ff = linear_pallas(x.reshape(B * S, D), lp["w_ff1"], lp["b_ff1"],
                           activation="relu", matmul_dtype=matmul_dtype)
        ff = linear_pallas(ff, lp["w_ff2"], lp["b_ff2"],
                           matmul_dtype=matmul_dtype)
        x = x + ff.reshape(B, S, D)

    x = layer_norm(x, prepped["lnf_g"], prepped["lnf_b"])
    # Final single-row projection: m == batch, far below an (8,128) tile — XLA.
    return x[:, -1, :].astype(jnp.float32) @ prepped["w_out"].astype(jnp.float32)


# --------------------------------------------------------------------------- #
# parameters (PyTorch layout) + one-time prep for the Pallas kernels
# --------------------------------------------------------------------------- #

def prepare_params(params, *, storage_dtype=None):
    """Transpose nn.Linear weights once to (in, out) for the canonical MXU
    contraction, fuse Q/K/V and fold exp(beta) into the q/k weights & biases;
    optionally cast weights to bf16 storage."""
    def cvt(w):
        wt = jnp.transpose(w)
        return wt.astype(storage_dtype) if storage_dtype is not None else wt

    prepped = dict(
        embedding=params["embedding"],
        lnf_g=params["lnf_g"], lnf_b=params["lnf_b"],
        w_out=cvt(params["w_out"]),
        layers=[],
    )
    for lp in params["layers"]:
        beta = jnp.exp(lp["beta"])
        w_qkv = jnp.concatenate([beta * lp["wq"], beta * lp["wk"], lp["wv"]], axis=0)
        b_qkv = jnp.concatenate([beta * lp["bq"], beta * lp["bk"], lp["bv"]], axis=0)
        prepped["layers"].append(dict(
            ln1_g=lp["ln1_g"], ln1_b=lp["ln1_b"],
            ln2_g=lp["ln2_g"], ln2_b=lp["ln2_b"],
            w_qkv=cvt(w_qkv), b_qkv=b_qkv,
            w_o=cvt(lp["wo"]), b_o=lp["bo"],
            w_ff1=cvt(lp["w_ff1"]), b_ff1=lp["b_ff1"],
            w_ff2=cvt(lp["w_ff2"]), b_ff2=lp["b_ff2"],
        ))
    return prepped


def init_params(key, *, vocab_size, emb_dim, output_dim, n_layers, n_heads,
                mlp_dim):
    def xavier(k, out_f, in_f):
        bound = math.sqrt(6.0 / (in_f + out_f))
        return jax.random.uniform(k, (out_f, in_f), jnp.float32, -bound, bound)

    def torch_w(k, out_f, in_f):
        bound = 1.0 / math.sqrt(in_f)
        return jax.random.uniform(k, (out_f, in_f), jnp.float32, -bound, bound)

    def torch_b(k, out_f, in_f):
        bound = 1.0 / math.sqrt(in_f)
        return jax.random.uniform(k, (out_f,), jnp.float32, -bound, bound)

    keys = jax.random.split(key, 2 + n_layers)
    params = dict(
        embedding=jax.random.normal(keys[0], (vocab_size, emb_dim), jnp.float32),
        lnf_g=jnp.ones((emb_dim,), jnp.float32),
        lnf_b=jnp.zeros((emb_dim,), jnp.float32),
        w_out=xavier(keys[1], output_dim, emb_dim),
        layers=[],
    )
    for li in range(n_layers):
        lk = jax.random.split(keys[2 + li], 11)
        params["layers"].append(dict(
            ln1_g=jnp.ones((emb_dim,), jnp.float32),
            ln1_b=jnp.zeros((emb_dim,), jnp.float32),
            ln2_g=jnp.ones((emb_dim,), jnp.float32),
            ln2_b=jnp.zeros((emb_dim,), jnp.float32),
            beta=jnp.zeros((1,), jnp.float32),
            wq=xavier(lk[0], emb_dim, emb_dim), bq=torch_b(lk[1], emb_dim, emb_dim),
            wk=xavier(lk[2], emb_dim, emb_dim), bk=torch_b(lk[3], emb_dim, emb_dim),
            wv=xavier(lk[4], emb_dim, emb_dim), bv=torch_b(lk[5], emb_dim, emb_dim),
            wo=xavier(lk[6], emb_dim, emb_dim),
            bo=jnp.zeros((emb_dim,), jnp.float32),
            w_ff1=torch_w(lk[7], mlp_dim, emb_dim),
            b_ff1=torch_b(lk[8], mlp_dim, emb_dim),
            w_ff2=torch_w(lk[9], emb_dim, mlp_dim),
            b_ff2=torch_b(lk[10], emb_dim, mlp_dim),
        ))
    return params


# --------------------------------------------------------------------------- #
# pure-JAX reference (mirrors the PyTorch forward)
# --------------------------------------------------------------------------- #

def reference_forward(tokens, params, *, n_heads, causal=True):
    B = tokens.shape[0]
    tok = tokens.reshape(B, -1).astype(jnp.int32)
    x = params["embedding"][tok]
    D = x.shape[-1]
    dh = D // n_heads
    rot_dim = 2 * ((D // (2 * n_heads)) // 2)

    def attn(xn, lp):
        b_, s_, _ = xn.shape
        q = xn @ lp["wq"].T + lp["bq"]
        k = xn @ lp["wk"].T + lp["bk"]
        v = xn @ lp["wv"].T + lp["bv"]
        q = apply_rope(q, n_heads, rot_dim)
        k = apply_rope(k, n_heads, rot_dim)

        def heads(t):
            return (t.reshape(b_, s_, n_heads, dh).transpose(0, 2, 1, 3)
                     .reshape(b_ * n_heads, s_, dh))

        q, k, v = heads(q), heads(k), heads(v)
        beta = jnp.exp(lp["beta"])
        q = jax.nn.softmax(beta * q, axis=-1)
        k = jax.nn.softmax(beta * k, axis=-1)
        if causal:
            kv = jnp.cumsum(k[..., :, None] * v[..., None, :], axis=1)
            kn = jnp.cumsum(k, axis=1)
            num = jnp.einsum("zsD,zsDd->zsd", q, kv)
            den = jnp.sum(q * kn, axis=-1, keepdims=True)
        else:
            kv = jnp.einsum("zsD,zsd->zDd", k, v)
            kn = jnp.sum(k, axis=1)
            num = jnp.einsum("zsD,zDd->zsd", q, kv)
            den = jnp.einsum("zsD,zD->zs", q, kn)[..., None]
        out = num / den
        out = (out.reshape(b_, n_heads, s_, dh).transpose(0, 2, 1, 3)
                  .reshape(b_, s_, D))
        return out @ lp["wo"].T + lp["bo"]

    for lp in params["layers"]:
        h = layer_norm(x, lp["ln1_g"], lp["ln1_b"])
        a = attn(h, lp)
        x = layer_norm(h + a, lp["ln2_g"], lp["ln2_b"])
        ff = jnp.maximum(x @ lp["w_ff1"].T + lp["b_ff1"], 0.0)
        ff = ff @ lp["w_ff2"].T + lp["b_ff2"]
        x = x + ff
    x = layer_norm(x, params["lnf_g"], params["lnf_b"])
    return x[:, -1] @ params["w_out"].T


# --------------------------------------------------------------------------- #
# main
# --------------------------------------------------------------------------- #

if __name__ == "__main__":
    key = jax.random.PRNGKey(0)
    batch, seq_len = 2, 8
    emb_dim, output_dim, n_layers, n_heads, vocab_size = 32, 10, 2, 4, 10
    mlp_dim = 2 * emb_dim

    kp, kx = jax.random.split(key)
    params = init_params(kp, vocab_size=vocab_size, emb_dim=emb_dim,
                         output_dim=output_dim, n_layers=n_layers,
                         n_heads=n_heads, mlp_dim=mlp_dim)
    tokens = jax.random.randint(kx, (batch, seq_len), 0, vocab_size)

    prepped = prepare_params(params)          # one-time weight transpose / fusion

    # causal path (f32 reference parity)
    fwd = jax.jit(functools.partial(ortho_linear_transformer,
                                    n_heads=n_heads, causal=True))
    out = jax.block_until_ready(fwd(tokens, prepped))
    assert out.shape == (batch, output_dim)
    ref = reference_forward(tokens, params, n_heads=n_heads, causal=True)
    err = float(jnp.max(jnp.abs(out - ref)))
    assert err < 2e-3, f"causal mismatch vs reference, max abs err = {err}"

    # non-causal path (chunked two-pass kernels)
    fwd_nc = jax.jit(functools.partial(ortho_linear_transformer,
                                       n_heads=n_heads, causal=False))
    out_nc = jax.block_until_ready(fwd_nc(tokens, prepped))
    ref_nc = reference_forward(tokens, params, n_heads=n_heads, causal=False)
    err_nc = float(jnp.max(jnp.abs(out_nc - ref_nc)))
    assert err_nc < 2e-3, f"non-causal mismatch vs reference, max abs err = {err_nc}"

    # bf16 MXU-operand path (f32 accumulation) — looser tolerance
    fwd_bf16 = jax.jit(functools.partial(ortho_linear_transformer,
                                         n_heads=n_heads, causal=True,
                                         matmul_dtype=jnp.bfloat16))
    out_bf16 = jax.block_until_ready(fwd_bf16(tokens, prepped))
    assert out_bf16.shape == (batch, output_dim)
    err_bf16 = float(jnp.max(jnp.abs(out_bf16 - ref)))
    assert err_bf16 < 2.5e-1, f"bf16 path drifted too far, max abs err = {err_bf16}"

    print("KERNEL_OK")
</pallas_src>

<mosaic_0001>
module attributes {stable_mosaic.version = 11 : i64} {
  func.func @_linear_kernel(%arg0: i32, %arg1: i32, %arg2: i32, %arg3: memref<16x32xf32, #tpu.memory_space<vmem>>, %arg4: memref<32x96xf32, #tpu.memory_space<vmem>>, %arg5: memref<1x96xf32, #tpu.memory_space<vmem>>, %arg6: memref<16x96xf32, #tpu.memory_space<vmem>>, %arg7: memref<16x96xf32, #tpu.memory_space<vmem>>) attributes {dimension_semantics = [#tpu.dimension_semantics<parallel>, #tpu.dimension_semantics<parallel>, #tpu.dimension_semantics<arbitrary>], iteration_bounds = array<i64: 1, 1, 1>, scalar_prefetch = 0 : i64, scratch_operands = 1 : i64, tpu.core_type = #tpu.core_type<tc>, window_params = [{transform_indices = @transform_0, window_bounds = array<i64: 16, 32>}, {transform_indices = @transform_1, window_bounds = array<i64: 32, 96>}, {transform_indices = @transform_2, window_bounds = array<i64: 1, 96>}, {transform_indices = @transform_3, window_bounds = array<i64: 16, 96>}]} {
    %c0_i32 = arith.constant 0 : i32
    %0 = arith.cmpi eq, %arg2, %c0_i32 : i32
    %1 = arith.extui %0 : i1 to i32
    %c0_i32_0 = arith.constant 0 : i32
    %2 = arith.cmpi ne, %1, %c0_i32_0 : i32
    scf.if %2 {
      %cst_10 = arith.constant 0.000000e+00 : f32
      %12 = vector.broadcast %cst_10 : f32 to vector<16x96xf32>
      %c0_11 = arith.constant 0 : index
      %c0_12 = arith.constant 0 : index
      %13 = vector.load %arg7[%c0_11, %c0_12] : memref<16x96xf32, #tpu.memory_space<vmem>>, vector<16x96xf32>
      tpu.vector_store %arg7[%c0_11, %c0_12], %12 {strides = array<i32>} : memref<16x96xf32, #tpu.memory_space<vmem>>, vector<16x96xf32>,
    } else {
    }
    %c0 = arith.constant 0 : index
    %c0_1 = arith.constant 0 : index
    %3 = vector.load %arg3[%c0, %c0_1] : memref<16x32xf32, #tpu.memory_space<vmem>>, vector<16x32xf32>
    %c0_2 = arith.constant 0 : index
    %c0_3 = arith.constant 0 : index
    %4 = vector.load %arg4[%c0_2, %c0_3] : memref<32x96xf32, #tpu.memory_space<vmem>>, vector<32x96xf32>
    %c0_4 = arith.constant 0 : index
    %c0_5 = arith.constant 0 : index
    %5 = vector.load %arg7[%c0_4, %c0_5] : memref<16x96xf32, #tpu.memory_space<vmem>>, vector<16x96xf32>
    %cst = arith.constant dense<0.000000e+00> : vector<16x96xf32>
    %6 = tpu.matmul %3, %4, %cst {dimension_numbers = #tpu.dot_dimension_numbers<[1], [0], [0], [1], [0, 0, 1, 1], [], []>} : vector<16x32xf32>, vector<32x96xf32>, vector<16x96xf32> -> vector<16x96xf32>
    %7 = arith.addf %5, %6 : vector<16x96xf32>
    %c0_6 = arith.constant 0 : index
    %c0_7 = arith.constant 0 : index
    %8 = vector.load %arg7[%c0_6, %c0_7] : memref<16x96xf32, #tpu.memory_space<vmem>>, vector<16x96xf32>
    tpu.vector_store %arg7[%c0_6, %c0_7], %7 {strides = array<i32>} : memref<16x96xf32, #tpu.memory_space<vmem>>, vector<16x96xf32>,
    %c0_i32_8 = arith.constant 0 : i32
    %9 = arith.cmpi eq, %arg2, %c0_i32_8 : i32
    %10 = arith.extui %9 : i1 to i32
    %c0_i32_9 = arith.constant 0 : i32
    %11 = arith.cmpi ne, %10, %c0_i32_9 : i32
    scf.if %11 {
      %c0_10 = arith.constant 0 : index
      %c0_11 = arith.constant 0 : index
      %12 = vector.load %arg7[%c0_10, %c0_11] : memref<16x96xf32, #tpu.memory_space<vmem>>, vector<16x96xf32>
      %c0_12 = arith.constant 0 : index
      %c0_13 = arith.constant 0 : index
      %13 = vector.load %arg5[%c0_12, %c0_13] : memref<1x96xf32, #tpu.memory_space<vmem>>, vector<1x96xf32>
      %14 = vector.broadcast %13 : vector<1x96xf32> to vector<16x96xf32>
      %15 = arith.addf %12, %14 : vector<16x96xf32>
      %c0_14 = arith.constant 0 : index
      %c0_15 = arith.constant 0 : index
      %16 = vector.load %arg6[%c0_14, %c0_15] : memref<16x96xf32, #tpu.memory_space<vmem>>, vector<16x96xf32>
      tpu.vector_store %arg6[%c0_14, %c0_15], %15 {strides = array<i32>} : memref<16x96xf32, #tpu.memory_space<vmem>>, vector<16x96xf32>,
    } else {
    }
    return
  }
  func.func @transform_0(%arg0: i32, %arg1: i32, %arg2: i32) -> (i32, i32) {
    %c0_i32 = arith.constant 0 : i32
    return %arg0, %arg2 : i32, i32
  }
  func.func @transform_1(%arg0: i32, %arg1: i32, %arg2: i32) -> (i32, i32) {
    %c0_i32 = arith.constant 0 : i32
    return %arg2, %arg1 : i32, i32
  }
  func.func @transform_2(%arg0: i32, %arg1: i32, %arg2: i32) -> (i32, i32) {
    %c0_i32 = arith.constant 0 : i32
    %c0_i32_0 = arith.constant 0 : i32
    return %c0_i32, %arg1 : i32, i32
  }
  func.func @transform_3(%arg0: i32, %arg1: i32, %arg2: i32) -> (i32, i32) {
    %c0_i32 = arith.constant 0 : i32
    return %arg0, %arg1 : i32, i32
  }
}

module attributes {stable_mosaic.version = 11 : i64} {
  func.func @_linear_kernel(%arg0: i32, %arg1: i32, %arg2: i32, %arg3: memref<16x32xf32, #tpu.memory_space<vmem>>, %arg4: memref<32x32xf32, #tpu.memory_space<vmem>>, %arg5: memref<1x32xf32, #tpu.memory_space<vmem>>, %arg6: memref<16x32xf32, #tpu.memory_space<vmem>>, %arg7: memref<16x32xf32, #tpu.memory_space<vmem>>) attributes {dimension_semantics = [#tpu.dimension_semantics<parallel>, #tpu.dimension_semantics<parallel>, #tpu.dimension_semantics<arbitrary>], iteration_bounds = array<i64: 1, 1, 1>, scalar_prefetch = 0 : i64, scratch_operands = 1 : i64, tpu.core_type = #tpu.core_type<tc>, window_params = [{transform_indices = @transform_0, window_bounds = array<i64: 16, 32>}, {transform_indices = @transform_1, window_bounds = array<i64: 32, 32>}, {transform_indices = @transform_2, window_bounds = array<i64: 1, 32>}, {transform_indices = @transform_3, window_bounds = array<i64: 16, 32>}]} {
    %c0_i32 = arith.constant 0 : i32
    %0 = arith.cmpi eq, %arg2, %c0_i32 : i32
    %1 = arith.extui %0 : i1 to i32
    %c0_i32_0 = arith.constant 0 : i32
    %2 = arith.cmpi ne, %1, %c0_i32_0 : i32
    scf.if %2 {
      %cst_10 = arith.constant 0.000000e+00 : f32
      %12 = vector.broadcast %cst_10 : f32 to vector<16x32xf32>
      %c0_11 = arith.constant 0 : index
      %c0_12 = arith.constant 0 : index
      %13 = vector.load %arg7[%c0_11, %c0_12] : memref<16x32xf32, #tpu.memory_space<vmem>>, vector<16x32xf32>
      tpu.vector_store %arg7[%c0_11, %c0_12], %12 {strides = array<i32>} : memref<16x32xf32, #tpu.memory_space<vmem>>, vector<16x32xf32>,
    } else {
    }
    %c0 = arith.constant 0 : index
    %c0_1 = arith.constant 0 : index
    %3 = vector.load %arg3[%c0, %c0_1] : memref<16x32xf32, #tpu.memory_space<vmem>>, vector<16x32xf32>
    %c0_2 = arith.constant 0 : index
    %c0_3 = arith.constant 0 : index
    %4 = vector.load %arg4[%c0_2, %c0_3] : memref<32x32xf32, #tpu.memory_space<vmem>>, vector<32x32xf32>
    %c0_4 = arith.constant 0 : index
    %c0_5 = arith.constant 0 : index
    %5 = vector.load %arg7[%c0_4, %c0_5] : memref<16x32xf32, #tpu.memory_space<vmem>>, vector<16x32xf32>
    %cst = arith.constant dense<0.000000e+00> : vector<16x32xf32>
    %6 = tpu.matmul %3, %4, %cst {dimension_numbers = #tpu.dot_dimension_numbers<[1], [0], [0], [1], [0, 0, 1, 1], [], []>} : vector<16x32xf32>, vector<32x32xf32>, vector<16x32xf32> -> vector<16x32xf32>
    %7 = arith.addf %5, %6 : vector<16x32xf32>
    %c0_6 = arith.constant 0 : index
    %c0_7 = arith.constant 0 : index
    %8 = vector.load %arg7[%c0_6, %c0_7] : memref<16x32xf32, #tpu.memory_space<vmem>>, vector<16x32xf32>
    tpu.vector_store %arg7[%c0_6, %c0_7], %7 {strides = array<i32>} : memref<16x32xf32, #tpu.memory_space<vmem>>, vector<16x32xf32>,
    %c0_i32_8 = arith.constant 0 : i32
    %9 = arith.cmpi eq, %arg2, %c0_i32_8 : i32
    %10 = arith.extui %9 : i1 to i32
    %c0_i32_9 = arith.constant 0 : i32
    %11 = arith.cmpi ne, %10, %c0_i32_9 : i32
    scf.if %11 {
      %c0_10 = arith.constant 0 : index
      %c0_11 = arith.constant 0 : index
      %12 = vector.load %arg7[%c0_10, %c0_11] : memref<16x32xf32, #tpu.memory_space<vmem>>, vector<16x32xf32>
      %c0_12 = arith.constant 0 : index
      %c0_13 = arith.constant 0 : index
      %13 = vector.load %arg5[%c0_12, %c0_13] : memref<1x32xf32, #tpu.memory_space<vmem>>, vector<1x32xf32>
      %14 = vector.broadcast %13 : vector<1x32xf32> to vector<16x32xf32>
      %15 = arith.addf %12, %14 : vector<16x32xf32>
      %c0_14 = arith.constant 0 : index
      %c0_15 = arith.constant 0 : index
      %16 = vector.load %arg6[%c0_14, %c0_15] : memref<16x32xf32, #tpu.memory_space<vmem>>, vector<16x32xf32>
      tpu.vector_store %arg6[%c0_14, %c0_15], %15 {strides = array<i32>} : memref<16x32xf32, #tpu.memory_space<vmem>>, vector<16x32xf32>,
    } else {
    }
    return
  }
  func.func @transform_0(%arg0: i32, %arg1: i32, %arg2: i32) -> (i32, i32) {
    %c0_i32 = arith.constant 0 : i32
    return %arg0, %arg2 : i32, i32
  }
  func.func @transform_1(%arg0: i32, %arg1: i32, %arg2: i32) -> (i32, i32) {
    %c0_i32 = arith.constant 0 : i32
    return %arg2, %arg1 : i32, i32
  }
  func.func @transform_2(%arg0: i32, %arg1: i32, %arg2: i32) -> (i32, i32) {
    %c0_i32 = arith.constant 0 : i32
    %c0_i32_0 = arith.constant 0 : i32
    return %c0_i32, %arg1 : i32, i32
  }
  func.func @transform_3(%arg0: i32, %arg1: i32, %arg2: i32) -> (i32, i32) {
    %c0_i32 = arith.constant 0 : i32
    return %arg0, %arg1 : i32, i32
  }
}

module attributes {stable_mosaic.version = 11 : i64} {
  func.func @_ortho_attn_causal_kernel(%arg0: i32, %arg1: i32, %arg2: memref<1x8x96xf32, #tpu.memory_space<vmem>>, %arg3: memref<8x8xf32, #tpu.memory_space<vmem>>, %arg4: memref<1x8x32xf32, #tpu.memory_space<vmem>>, %arg5: memref<4x8x9xf32, #tpu.memory_space<vmem>>) attributes {dimension_semantics = [#tpu.dimension_semantics<parallel>, #tpu.dimension_semantics<arbitrary>], iteration_bounds = array<i64: 2, 1>, scalar_prefetch = 0 : i64, scratch_operands = 1 : i64, tpu.core_type = #tpu.core_type<tc>, window_params = [{transform_indices = @transform_0, window_bounds = array<i64: 1, 8, 96>}, {transform_indices = @transform_1, window_bounds = array<i64: 8, 8>}, {transform_indices = @transform_2, window_bounds = array<i64: 1, 8, 32>}]} {
    %c0_i32 = arith.constant 0 : i32
    %0 = arith.cmpi eq, %arg1, %c0_i32 : i32
    %1 = arith.extui %0 : i1 to i32
    %c0_i32_0 = arith.constant 0 : i32
    %2 = arith.cmpi ne, %1, %c0_i32_0 : i32
    scf.if %2 {
      %cst_126 = arith.constant 0.000000e+00 : f32
      %350 = vector.broadcast %cst_126 : f32 to vector<4x8x9xf32>
      %c0_127 = arith.constant 0 : index
      %c0_128 = arith.constant 0 : index
      %c0_129 = arith.constant 0 : index
      %351 = vector.load %arg5[%c0_127, %c0_128, %c0_129] : memref<4x8x9xf32, #tpu.memory_space<vmem>>, vector<4x8x9xf32>
      tpu.vector_store %arg5[%c0_127, %c0_128, %c0_129], %350 {strides = array<i32>} : memref<4x8x9xf32, #tpu.memory_space<vmem>>, vector<4x8x9xf32>,
    } else {
    }
    %c0 = arith.constant 0 : index
    %c0_1 = arith.constant 0 : index
    %3 = vector.load %arg3[%c0, %c0_1] : memref<8x8xf32, #tpu.memory_space<vmem>>, vector<8x4xf32>
    %c0_2 = arith.constant 0 : index
    %c4 = arith.constant 4 : index
    %4 = vector.load %arg3[%c0_2, %c4] : memref<8x8xf32, #tpu.memory_space<vmem>>, vector<8x4xf32>
    %5 = tpu.iota {dimensions = array<i32: 0>} : vector<4x4xi32>
    %6 = tpu.iota {dimensions = array<i32: 1>} : vector<4x4xi32>
    %c2_i32 = arith.constant 2 : i32
    %c0_i32_3 = arith.constant 0 : i32
    %7 = arith.cmpi eq, %c2_i32, %c0_i32_3 : i32
    %c1_i32 = arith.constant 1 : i32
    %8 = arith.select %7, %c1_i32, %c2_i32 : i32
    %9 = vector.broadcast %8 : i32 to vector<4x4xi32>
    %10 = arith.remsi %5, %9 : vector<4x4xi32>
    %c0_i32_4 = arith.constant 0 : i32
    %11 = vector.broadcast %c0_i32_4 : i32 to vector<4x4xi32>
    %12 = arith.cmpi ne, %10, %11 : vector<4x4xi32>
    %c0_i32_5 = arith.constant 0 : i32
    %13 = vector.broadcast %c0_i32_5 : i32 to vector<4x4xi32>
    %14 = arith.cmpi slt, %10, %13 : vector<4x4xi32>
    %c0_i32_6 = arith.constant 0 : i32
    %15 = arith.cmpi slt, %8, %c0_i32_6 : i32
    %16 = vector.broadcast %15 : i1 to vector<4x4xi1>
    %17 = vector.broadcast %16 : vector<4x4xi1> to vector<4x4xi1>
    %18 = arith.xori %14, %17 : vector<4x4xi1>
    %19 = arith.andi %18, %12 : vector<4x4xi1>
    %20 = vector.broadcast %8 : i32 to vector<4x4xi32>
    %21 = arith.addi %10, %20 : vector<4x4xi32>
    %22 = arith.select %19, %21, %10 : vector<4x4xi1>, vector<4x4xi32>
    %c0_i32_7 = arith.constant 0 : i32
    %23 = vector.broadcast %c0_i32_7 : i32 to vector<4x4xi32>
    %24 = arith.cmpi eq, %22, %23 : vector<4x4xi32>
    %c1_i32_8 = arith.constant 1 : i32
    %25 = vector.broadcast %c1_i32_8 : i32 to vector<4x4xi32>
    %26 = arith.addi %5, %25 : vector<4x4xi32>
    %27 = arith.cmpi eq, %6, %26 : vector<4x4xi32>
    %28 = arith.andi %24, %27 : vector<4x4xi1>
    %cst = arith.constant 1.000000e+00 : f32
    %cst_9 = arith.constant 0.000000e+00 : f32
    %29 = vector.broadcast %cst : f32 to vector<4x4xf32>
    %30 = vector.broadcast %cst_9 : f32 to vector<4x4xf32>
    %31 = arith.select %28, %29, %30 : vector<4x4xi1>, vector<4x4xf32>
    %c2_i32_10 = arith.constant 2 : i32
    %c0_i32_11 = arith.constant 0 : i32
    %32 = arith.cmpi eq, %c2_i32_10, %c0_i32_11 : i32
    %c1_i32_12 = arith.constant 1 : i32
    %33 = arith.select %32, %c1_i32_12, %c2_i32_10 : i32
    %34 = vector.broadcast %33 : i32 to vector<4x4xi32>
    %35 = arith.remsi %5, %34 : vector<4x4xi32>
    %c0_i32_13 = arith.constant 0 : i32
    %36 = vector.broadcast %c0_i32_13 : i32 to vector<4x4xi32>
    %37 = arith.cmpi ne, %35, %36 : vector<4x4xi32>
    %c0_i32_14 = arith.constant 0 : i32
    %38 = vector.broadcast %c0_i32_14 : i32 to vector<4x4xi32>
    %39 = arith.cmpi slt, %35, %38 : vector<4x4xi32>
    %c0_i32_15 = arith.constant 0 : i32
    %40 = arith.cmpi slt, %33, %c0_i32_15 : i32
    %41 = vector.broadcast %40 : i1 to vector<4x4xi1>
    %42 = vector.broadcast %41 : vector<4x4xi1> to vector<4x4xi1>
    %43 = arith.xori %39, %42 : vector<4x4xi1>
    %44 = arith.andi %43, %37 : vector<4x4xi1>
    %45 = vector.broadcast %33 : i32 to vector<4x4xi32>
    %46 = arith.addi %35, %45 : vector<4x4xi32>
    %47 = arith.select %44, %46, %35 : vector<4x4xi1>, vector<4x4xi32>
    %c1_i32_16 = arith.constant 1 : i32
    %48 = vector.broadcast %c1_i32_16 : i32 to vector<4x4xi32>
    %49 = arith.cmpi eq, %47, %48 : vector<4x4xi32>
    %c1_i32_17 = arith.constant 1 : i32
    %50 = vector.broadcast %c1_i32_17 : i32 to vector<4x4xi32>
    %51 = arith.subi %5, %50 : vector<4x4xi32>
    %52 = arith.cmpi eq, %6, %51 : vector<4x4xi32>
    %53 = arith.andi %49, %52 : vector<4x4xi1>
    %cst_18 = arith.constant 1.000000e+00 : f32
    %cst_19 = arith.constant 0.000000e+00 : f32
    %54 = vector.broadcast %cst_18 : f32 to vector<4x4xf32>
    %55 = vector.broadcast %cst_19 : f32 to vector<4x4xf32>
    %56 = arith.select %53, %54, %55 : vector<4x4xi1>, vector<4x4xf32>
    %57 = arith.subf %31, %56 : vector<4x4xf32>
    %58 = tpu.iota {dimensions = array<i32: 0>} : vector<8x8xi32>
    %59 = tpu.iota {dimensions = array<i32: 1>} : vector<8x8xi32>
    %60 = arith.cmpi sle, %59, %58 : vector<8x8xi32>
    %cst_20 = arith.constant 1.000000e+00 : f32
    %61 = vector.broadcast %cst_20 : f32 to vector<8x1xf32>
    %c0_21 = arith.constant 0 : index
    %c0_22 = arith.constant 0 : index
    %c0_23 = arith.constant 0 : index
    %62 = vector.load %arg2[%c0_21, %c0_22, %c0_23] : memref<1x8x96xf32, #tpu.memory_space<vmem>>, vector<1x8x8xf32>
    %63 = vector.shape_cast %62 : vector<1x8x8xf32> to vector<8x8xf32>
    %64 = vector.extract_strided_slice %63 {offsets = [0, 0], sizes = [8, 4], strides = [1, 1]} : vector<8x8xf32> to vector<8x4xf32>
    %65 = arith.mulf %64, %3 : vector<8x4xf32>
    %cst_24 = arith.constant dense<0.000000e+00> : vector<8x4xf32>
    %66 = tpu.matmul %64, %57, %cst_24 {dimension_numbers = #tpu.dot_dimension_numbers<[1], [0], [0], [1], [0, 0, 1, 1], [], []>} : vector<8x4xf32>, vector<4x4xf32>, vector<8x4xf32> -> vector<8x4xf32>
    %67 = arith.mulf %66, %4 : vector<8x4xf32>
    %68 = arith.addf %65, %67 : vector<8x4xf32>
    %69 = vector.extract_strided_slice %63 {offsets = [0, 4], sizes = [8, 4], strides = [1, 1]} : vector<8x8xf32> to vector<8x4xf32>
    %70 = tpu.concatenate %68, %69 in 1 : vector<8x4xf32>, vector<8x4xf32> -> vector<8x8xf32>
    %cst_25 = arith.constant dense<0xFF800000> : vector<8xf32>
    %71 = vector.multi_reduction <maximumf>, %70, %cst_25 [1] : vector<8x8xf32> to vector<8xf32>
    %72 = vector.shape_cast %71 : vector<8xf32> to vector<8x1xf32>
    %73 = vector.broadcast %72 : vector<8x1xf32> to vector<8x8xf32>
    %74 = arith.subf %70, %73 : vector<8x8xf32>
    %75 = math.exp %74 : vector<8x8xf32>
    %cst_26 = arith.constant dense<0.000000e+00> : vector<8xf32>
    %76 = vector.multi_reduction <add>, %75, %cst_26 [1] : vector<8x8xf32> to vector<8xf32>
    %77 = vector.shape_cast %76 : vector<8xf32> to vector<8x1xf32>
    %78 = tpu.reciprocal %77 {approx = true} : vector<8x1xf32> -> vector<8x1xf32>
    %79 = arith.mulf %77, %78 : vector<8x1xf32>
    %cst_27 = arith.constant 2.000000e+00 : f32
    %80 = vector.broadcast %cst_27 : f32 to vector<8x1xf32>
    %81 = arith.subf %80, %79 : vector<8x1xf32>
    %82 = arith.mulf %78, %81 : vector<8x1xf32>
    %83 = vector.broadcast %82 : vector<8x1xf32> to vector<8x8xf32>
    %84 = arith.mulf %75, %83 : vector<8x8xf32>
    %c0_28 = arith.constant 0 : index
    %c0_29 = arith.constant 0 : index
    %c32 = arith.constant 32 : index
    %85 = vector.load %arg2[%c0_28, %c0_29, %c32] : memref<1x8x96xf32, #tpu.memory_space<vmem>>, vector<1x8x8xf32>
    %86 = vector.shape_cast %85 : vector<1x8x8xf32> to vector<8x8xf32>
    %87 = vector.extract_strided_slice %86 {offsets = [0, 0], sizes = [8, 4], strides = [1, 1]} : vector<8x8xf32> to vector<8x4xf32>
    %88 = arith.mulf %87, %3 : vector<8x4xf32>
    %cst_30 = arith.constant dense<0.000000e+00> : vector<8x4xf32>
    %89 = tpu.matmul %87, %57, %cst_30 {dimension_numbers = #tpu.dot_dimension_numbers<[1], [0], [0], [1], [0, 0, 1, 1], [], []>} : vector<8x4xf32>, vector<4x4xf32>, vector<8x4xf32> -> vector<8x4xf32>
    %90 = arith.mulf %89, %4 : vector<8x4xf32>
    %91 = arith.addf %88, %90 : vector<8x4xf32>
    %92 = vector.extract_strided_slice %86 {offsets = [0, 4], sizes = [8, 4], strides = [1, 1]} : vector<8x8xf32> to vector<8x4xf32>
    %93 = tpu.concatenate %91, %92 in 1 : vector<8x4xf32>, vector<8x4xf32> -> vector<8x8xf32>
    %cst_31 = arith.constant dense<0xFF800000> : vector<8xf32>
    %94 = vector.multi_reduction <maximumf>, %93, %cst_31 [1] : vector<8x8xf32> to vector<8xf32>
    %95 = vector.shape_cast %94 : vector<8xf32> to vector<8x1xf32>
    %96 = vector.broadcast %95 : vector<8x1xf32> to vector<8x8xf32>
    %97 = arith.subf %93, %96 : vector<8x8xf32>
    %98 = math.exp %97 : vector<8x8xf32>
    %cst_32 = arith.constant dense<0.000000e+00> : vector<8xf32>
    %99 = vector.multi_reduction <add>, %98, %cst_32 [1] : vector<8x8xf32> to vector<8xf32>
    %100 = vector.shape_cast %99 : vector<8xf32> to vector<8x1xf32>
    %101 = tpu.reciprocal %100 {approx = true} : vector<8x1xf32> -> vector<8x1xf32>
    %102 = arith.mulf %100, %101 : vector<8x1xf32>
    %cst_33 = arith.constant 2.000000e+00 : f32
    %103 = vector.broadcast %cst_33 : f32 to vector<8x1xf32>
    %104 = arith.subf %103, %102 : vector<8x1xf32>
    %105 = arith.mulf %101, %104 : vector<8x1xf32>
    %106 = vector.broadcast %105 : vector<8x1xf32> to vector<8x8xf32>
    %107 = arith.mulf %98, %106 : vector<8x8xf32>
    %c0_34 = arith.constant 0 : index
    %c0_35 = arith.constant 0 : index
    %c64 = arith.constant 64 : index
    %108 = vector.load %arg2[%c0_34, %c0_35, %c64] : memref<1x8x96xf32, #tpu.memory_space<vmem>>, vector<1x8x8xf32>
    %109 = vector.shape_cast %108 : vector<1x8x8xf32> to vector<8x8xf32>
    %110 = tpu.concatenate %109, %61 in 1 : vector<8x8xf32>, vector<8x1xf32> -> vector<8x9xf32>
    %c0_36 = arith.constant 0 : index
    %c0_37 = arith.constant 0 : index
    %c0_38 = arith.constant 0 : index
    %111 = vector.load %arg5[%c0_36, %c0_37, %c0_38] : memref<4x8x9xf32, #tpu.memory_space<vmem>>, vector<1x8x9xf32>
    %112 = vector.shape_cast %111 : vector<1x8x9xf32> to vector<8x9xf32>
    %cst_39 = arith.constant dense<0.000000e+00> : vector<8x8xf32>
    %113 = tpu.matmul %84, %107, %cst_39 {dimension_numbers = #tpu.dot_dimension_numbers<[1], [1], [0], [0], [0, 0, 1, 0], [], []>} : vector<8x8xf32>, vector<8x8xf32>, vector<8x8xf32> -> vector<8x8xf32>
    %cst_40 = arith.constant 0.000000e+00 : f32
    %114 = vector.broadcast %cst_40 : f32 to vector<8x8xf32>
    %115 = arith.select %60, %113, %114 : vector<8x8xi1>, vector<8x8xf32>
    %cst_41 = arith.constant dense<0.000000e+00> : vector<8x9xf32>
    %116 = tpu.matmul %115, %110, %cst_41 {dimension_numbers = #tpu.dot_dimension_numbers<[1], [0], [0], [1], [0, 0, 1, 1], [], []>} : vector<8x8xf32>, vector<8x9xf32>, vector<8x9xf32> -> vector<8x9xf32>
    %cst_42 = arith.constant dense<0.000000e+00> : vector<8x9xf32>
    %117 = tpu.matmul %84, %112, %cst_42 {dimension_numbers = #tpu.dot_dimension_numbers<[1], [0], [0], [1], [0, 0, 1, 1], [], []>} : vector<8x8xf32>, vector<8x9xf32>, vector<8x9xf32> -> vector<8x9xf32>
    %118 = arith.addf %116, %117 : vector<8x9xf32>
    %cst_43 = arith.constant dense<0.000000e+00> : vector<8x9xf32>
    %119 = tpu.matmul %107, %110, %cst_43 {dimension_numbers = #tpu.dot_dimension_numbers<[0], [0], [1], [1], [0, 1, 1, 1], [], []>} : vector<8x8xf32>, vector<8x9xf32>, vector<8x9xf32> -> vector<8x9xf32>
    %120 = arith.addf %112, %119 : vector<8x9xf32>
    %c0_44 = arith.constant 0 : index
    %c0_45 = arith.constant 0 : index
    %c0_46 = arith.constant 0 : index
    %121 = vector.load %arg5[%c0_44, %c0_45, %c0_46] : memref<4x8x9xf32, #tpu.memory_space<vmem>>, vector<1x8x9xf32>
    %122 = vector.shape_cast %121 : vector<1x8x9xf32> to vector<8x9xf32>
    %123 = vector.shape_cast %120 : vector<8x9xf32> to vector<1x8x9xf32>
    tpu.vector_store %arg5[%c0_44, %c0_45, %c0_46], %123 {strides = array<i32>} : memref<4x8x9xf32, #tpu.memory_space<vmem>>, vector<1x8x9xf32>,
    %124 = vector.extract_strided_slice %118 {offsets = [0, 0], sizes = [8, 8], strides = [1, 1]} : vector<8x9xf32> to vector<8x8xf32>
    %125 = vector.extract_strided_slice %118 {offsets = [0, 8], sizes = [8, 1], strides = [1, 1]} : vector<8x9xf32> to vector<8x1xf32>
    %126 = tpu.reciprocal %125 {approx = true} : vector<8x1xf32> -> vector<8x1xf32>
    %127 = arith.mulf %125, %126 : vector<8x1xf32>
    %cst_47 = arith.constant 2.000000e+00 : f32
    %128 = vector.broadcast %cst_47 : f32 to vector<8x1xf32>
    %129 = arith.subf %128, %127 : vector<8x1xf32>
    %130 = arith.mulf %126, %129 : vector<8x1xf32>
    %131 = vector.broadcast %130 : vector<8x1xf32> to vector<8x8xf32>
    %132 = arith.mulf %124, %131 : vector<8x8xf32>
    %c0_48 = arith.constant 0 : index
    %c0_49 = arith.constant 0 : index
    %c8 = arith.constant 8 : index
    %133 = vector.load %arg2[%c0_48, %c0_49, %c8] : memref<1x8x96xf32, #tpu.memory_space<vmem>>, vector<1x8x8xf32>
    %134 = vector.shape_cast %133 : vector<1x8x8xf32> to vector<8x8xf32>
    %135 = vector.extract_strided_slice %134 {offsets = [0, 0], sizes = [8, 4], strides = [1, 1]} : vector<8x8xf32> to vector<8x4xf32>
    %136 = arith.mulf %135, %3 : vector<8x4xf32>
    %cst_50 = arith.constant dense<0.000000e+00> : vector<8x4xf32>
    %137 = tpu.matmul %135, %57, %cst_50 {dimension_numbers = #tpu.dot_dimension_numbers<[1], [0], [0], [1], [0, 0, 1, 1], [], []>} : vector<8x4xf32>, vector<4x4xf32>, vector<8x4xf32> -> vector<8x4xf32>
    %138 = arith.mulf %137, %4 : vector<8x4xf32>
    %139 = arith.addf %136, %138 : vector<8x4xf32>
    %140 = vector.extract_strided_slice %134 {offsets = [0, 4], sizes = [8, 4], strides = [1, 1]} : vector<8x8xf32> to vector<8x4xf32>
    %141 = tpu.concatenate %139, %140 in 1 : vector<8x4xf32>, vector<8x4xf32> -> vector<8x8xf32>
    %cst_51 = arith.constant dense<0xFF800000> : vector<8xf32>
    %142 = vector.multi_reduction <maximumf>, %141, %cst_51 [1] : vector<8x8xf32> to vector<8xf32>
    %143 = vector.shape_cast %142 : vector<8xf32> to vector<8x1xf32>
    %144 = vector.broadcast %143 : vector<8x1xf32> to vector<8x8xf32>
    %145 = arith.subf %141, %144 : vector<8x8xf32>
    %146 = math.exp %145 : vector<8x8xf32>
    %cst_52 = arith.constant dense<0.000000e+00> : vector<8xf32>
    %147 = vector.multi_reduction <add>, %146, %cst_52 [1] : vector<8x8xf32> to vector<8xf32>
    %148 = vector.shape_cast %147 : vector<8xf32> to vector<8x1xf32>
    %149 = tpu.reciprocal %148 {approx = true} : vector<8x1xf32> -> vector<8x1xf32>
    %150 = arith.mulf %148, %149 : vector<8x1xf32>
    %cst_53 = arith.constant 2.000000e+00 : f32
    %151 = vector.broadcast %cst_53 : f32 to vector<8x1xf32>
    %152 = arith.subf %151, %150 : vector<8x1xf32>
    %153 = arith.mulf %149, %152 : vector<8x1xf32>
    %154 = vector.broadcast %153 : vector<8x1xf32> to vector<8x8xf32>
    %155 = arith.mulf %146, %154 : vector<8x8xf32>
    %c0_54 = arith.constant 0 : index
    %c0_55 = arith.constant 0 : index
    %c40 = arith.constant 40 : index
    %156 = vector.load %arg2[%c0_54, %c0_55, %c40] : memref<1x8x96xf32, #tpu.memory_space<vmem>>, vector<1x8x8xf32>
    %157 = vector.shape_cast %156 : vector<1x8x8xf32> to vector<8x8xf32>
    %158 = vector.extract_strided_slice %157 {offsets = [0, 0], sizes = [8, 4], strides = [1, 1]} : vector<8x8xf32> to vector<8x4xf32>
    %159 = arith.mulf %158, %3 : vector<8x4xf32>
    %cst_56 = arith.constant dense<0.000000e+00> : vector<8x4xf32>
    %160 = tpu.matmul %158, %57, %cst_56 {dimension_numbers = #tpu.dot_dimension_numbers<[1], [0], [0], [1], [0, 0, 1, 1], [], []>} : vector<8x4xf32>, vector<4x4xf32>, vector<8x4xf32> -> vector<8x4xf32>
    %161 = arith.mulf %160, %4 : vector<8x4xf32>
    %162 = arith.addf %159, %161 : vector<8x4xf32>
    %163 = vector.extract_strided_slice %157 {offsets = [0, 4], sizes = [8, 4], strides = [1, 1]} : vector<8x8xf32> to vector<8x4xf32>
    %164 = tpu.concatenate %162, %163 in 1 : vector<8x4xf32>, vector<8x4xf32> -> vector<8x8xf32>
    %cst_57 = arith.constant dense<0xFF800000> : vector<8xf32>
    %165 = vector.multi_reduction <maximumf>, %164, %cst_57 [1] : vector<8x8xf32> to vector<8xf32>
    %166 = vector.shape_cast %165 : vector<8xf32> to vector<8x1xf32>
    %167 = vector.broadcast %166 : vector<8x1xf32> to vector<8x8xf32>
    %168 = arith.subf %164, %167 : vector<8x8xf32>
    %169 = math.exp %168 : vector<8x8xf32>
    %cst_58 = arith.constant dense<0.000000e+00> : vector<8xf32>
    %170 = vector.multi_reduction <add>, %169, %cst_58 [1] : vector<8x8xf32> to vector<8xf32>
    %171 = vector.shape_cast %170 : vector<8xf32> to vector<8x1xf32>
    %172 = tpu.reciprocal %171 {approx = true} : vector<8x1xf32> -> vector<8x1xf32>
    %173 = arith.mulf %171, %172 : vector<8x1xf32>
    %cst_59 = arith.constant 2.000000e+00 : f32
    %174 = vector.broadcast %cst_59 : f32 to vector<8x1xf32>
    %175 = arith.subf %174, %173 : vector<8x1xf32>
    %176 = arith.mulf %172, %175 : vector<8x1xf32>
    %177 = vector.broadcast %176 : vector<8x1xf32> to vector<8x8xf32>
    %178 = arith.mulf %169, %177 : vector<8x8xf32>
    %c0_60 = arith.constant 0 : index
    %c0_61 = arith.constant 0 : index
    %c72 = arith.constant 72 : index
    %179 = vector.load %arg2[%c0_60, %c0_61, %c72] : memref<1x8x96xf32, #tpu.memory_space<vmem>>, vector<1x8x8xf32>
    %180 = vector.shape_cast %179 : vector<1x8x8xf32> to vector<8x8xf32>
    %181 = tpu.concatenate %180, %61 in 1 : vector<8x8xf32>, vector<8x1xf32> -> vector<8x9xf32>
    %c1 = arith.constant 1 : index
    %c0_62 = arith.constant 0 : index
    %c0_63 = arith.constant 0 : index
    %182 = vector.load %arg5[%c1, %c0_62, %c0_63] : memref<4x8x9xf32, #tpu.memory_space<vmem>>, vector<1x8x9xf32>
    %183 = vector.shape_cast %182 : vector<1x8x9xf32> to vector<8x9xf32>
    %cst_64 = arith.constant dense<0.000000e+00> : vector<8x8xf32>
    %184 = tpu.matmul %155, %178, %cst_64 {dimension_numbers = #tpu.dot_dimension_numbers<[1], [1], [0], [0], [0, 0, 1, 0], [], []>} : vector<8x8xf32>, vector<8x8xf32>, vector<8x8xf32> -> vector<8x8xf32>
    %cst_65 = arith.constant 0.000000e+00 : f32
    %185 = vector.broadcast %cst_65 : f32 to vector<8x8xf32>
    %186 = arith.select %60, %184, %185 : vector<8x8xi1>, vector<8x8xf32>
    %cst_66 = arith.constant dense<0.000000e+00> : vector<8x9xf32>
    %187 = tpu.matmul %186, %181, %cst_66 {dimension_numbers = #tpu.dot_dimension_numbers<[1], [0], [0], [1], [0, 0, 1, 1], [], []>} : vector<8x8xf32>, vector<8x9xf32>, vector<8x9xf32> -> vector<8x9xf32>
    %cst_67 = arith.constant dense<0.000000e+00> : vector<8x9xf32>
    %188 = tpu.matmul %155, %183, %cst_67 {dimension_numbers = #tpu.dot_dimension_numbers<[1], [0], [0], [1], [0, 0, 1, 1], [], []>} : vector<8x8xf32>, vector<8x9xf32>, vector<8x9xf32> -> vector<8x9xf32>
    %189 = arith.addf %187, %188 : vector<8x9xf32>
    %cst_68 = arith.constant dense<0.000000e+00> : vector<8x9xf32>
    %190 = tpu.matmul %178, %181, %cst_68 {dimension_numbers = #tpu.dot_dimension_numbers<[0], [0], [1], [1], [0, 1, 1, 1], [], []>} : vector<8x8xf32>, vector<8x9xf32>, vector<8x9xf32> -> vector<8x9xf32>
    %191 = arith.addf %183, %190 : vector<8x9xf32>
    %c1_69 = arith.constant 1 : index
    %c0_70 = arith.constant 0 : index
    %c0_71 = arith.constant 0 : index
    %192 = vector.load %arg5[%c1_69, %c0_70, %c0_71] : memref<4x8x9xf32, #tpu.memory_space<vmem>>, vector<1x8x9xf32>
    %193 = vector.shape_cast %192 : vector<1x8x9xf32> to vector<8x9xf32>
    %194 = vector.shape_cast %191 : vector<8x9xf32> to vector<1x8x9xf32>
    tpu.vector_store %arg5[%c1_69, %c0_70, %c0_71], %194 {strides = array<i32>} : memref<4x8x9xf32, #tpu.memory_space<vmem>>, vector<1x8x9xf32>,
    %195 = vector.extract_strided_slice %189 {offsets = [0, 0], sizes = [8, 8], strides = [1, 1]} : vector<8x9xf32> to vector<8x8xf32>
    %196 = vector.extract_strided_slice %189 {offsets = [0, 8], sizes = [8, 1], strides = [1, 1]} : vector<8x9xf32> to vector<8x1xf32>
    %197 = tpu.reciprocal %196 {approx = true} : vector<8x1xf32> -> vector<8x1xf32>
    %198 = arith.mulf %196, %197 : vector<8x1xf32>
    %cst_72 = arith.constant 2.000000e+00 : f32
    %199 = vector.broadcast %cst_72 : f32 to vector<8x1xf32>
    %200 = arith.subf %199, %198 : vector<8x1xf32>
    %201 = arith.mulf %197, %200 : vector<8x1xf32>
    %202 = vector.broadcast %201 : vector<8x1xf32> to vector<8x8xf32>
    %203 = arith.mulf %195, %202 : vector<8x8xf32>
    %c0_73 = arith.constant 0 : index
    %c0_74 = arith.constant 0 : index
    %c16 = arith.constant 16 : index
    %204 = vector.load %arg2[%c0_73, %c0_74, %c16] : memref<1x8x96xf32, #tpu.memory_space<vmem>>, vector<1x8x8xf32>
    %205 = vector.shape_cast %204 : vector<1x8x8xf32> to vector<8x8xf32>
    %206 = vector.extract_strided_slice %205 {offsets = [0, 0], sizes = [8, 4], strides = [1, 1]} : vector<8x8xf32> to vector<8x4xf32>
    %207 = arith.mulf %206, %3 : vector<8x4xf32>
    %cst_75 = arith.constant dense<0.000000e+00> : vector<8x4xf32>
    %208 = tpu.matmul %206, %57, %cst_75 {dimension_numbers = #tpu.dot_dimension_numbers<[1], [0], [0], [1], [0, 0, 1, 1], [], []>} : vector<8x4xf32>, vector<4x4xf32>, vector<8x4xf32> -> vector<8x4xf32>
    %209 = arith.mulf %208, %4 : vector<8x4xf32>
    %210 = arith.addf %207, %209 : vector<8x4xf32>
    %211 = vector.extract_strided_slice %205 {offsets = [0, 4], sizes = [8, 4], strides = [1, 1]} : vector<8x8xf32> to vector<8x4xf32>
    %212 = tpu.concatenate %210, %211 in 1 : vector<8x4xf32>, vector<8x4xf32> -> vector<8x8xf32>
    %cst_76 = arith.constant dense<0xFF800000> : vector<8xf32>
    %213 = vector.multi_reduction <maximumf>, %212, %cst_76 [1] : vector<8x8xf32> to vector<8xf32>
    %214 = vector.shape_cast %213 : vector<8xf32> to vector<8x1xf32>
    %215 = vector.broadcast %214 : vector<8x1xf32> to vector<8x8xf32>
    %216 = arith.subf %212, %215 : vector<8x8xf32>
    %217 = math.exp %216 : vector<8x8xf32>
    %cst_77 = arith.constant dense<0.000000e+00> : vector<8xf32>
    %218 = vector.multi_reduction <add>, %217, %cst_77 [1] : vector<8x8xf32> to vector<8xf32>
    %219 = vector.shape_cast %218 : vector<8xf32> to vector<8x1xf32>
    %220 = tpu.reciprocal %219 {approx = true} : vector<8x1xf32> -> vector<8x1xf32>
    %221 = arith.mulf %219, %220 : vector<8x1xf32>
    %cst_78 = arith.constant 2.000000e+00 : f32
    %222 = vector.broadcast %cst_78 : f32 to vector<8x1xf32>
    %223 = arith.subf %222, %221 : vector<8x1xf32>
    %224 = arith.mulf %220, %223 : vector<8x1xf32>
    %225 = vector.broadcast %224 : vector<8x1xf32> to vector<8x8xf32>
    %226 = arith.mulf %217, %225 : vector<8x8xf32>
    %c0_79 = arith.constant 0 : index
    %c0_80 = arith.constant 0 : index
    %c48 = arith.constant 48 : index
    %227 = vector.load %arg2[%c0_79, %c0_80, %c48] : memref<1x8x96xf32, #tpu.memory_space<vmem>>, vector<1x8x8xf32>
    %228 = vector.shape_cast %227 : vector<1x8x8xf32> to vector<8x8xf32>
    %229 = vector.extract_strided_slice %228 {offsets = [0, 0], sizes = [8, 4], strides = [1, 1]} : vector<8x8xf32> to vector<8x4xf32>
    %230 = arith.mulf %229, %3 : vector<8x4xf32>
    %cst_81 = arith.constant dense<0.000000e+00> : vector<8x4xf32>
    %231 = tpu.matmul %229, %57, %cst_81 {dimension_numbers = #tpu.dot_dimension_numbers<[1], [0], [0], [1], [0, 0, 1, 1], [], []>} : vector<8x4xf32>, vector<4x4xf32>, vector<8x4xf32> -> vector<8x4xf32>
    %232 = arith.mulf %231, %4 : vector<8x4xf32>
    %233 = arith.addf %230, %232 : vector<8x4xf32>
    %234 = vector.extract_strided_slice %228 {offsets = [0, 4], sizes = [8, 4], strides = [1, 1]} : vector<8x8xf32> to vector<8x4xf32>
    %235 = tpu.concatenate %233, %234 in 1 : vector<8x4xf32>, vector<8x4xf32> -> vector<8x8xf32>
    %cst_82 = arith.constant dense<0xFF800000> : vector<8xf32>
    %236 = vector.multi_reduction <maximumf>, %235, %cst_82 [1] : vector<8x8xf32> to vector<8xf32>
    %237 = vector.shape_cast %236 : vector<8xf32> to vector<8x1xf32>
    %238 = vector.broadcast %237 : vector<8x1xf32> to vector<8x8xf32>
    %239 = arith.subf %235, %238 : vector<8x8xf32>
    %240 = math.exp %239 : vector<8x8xf32>
    %cst_83 = arith.constant dense<0.000000e+00> : vector<8xf32>
    %241 = vector.multi_reduction <add>, %240, %cst_83 [1] : vector<8x8xf32> to vector<8xf32>
    %242 = vector.shape_cast %241 : vector<8xf32> to vector<8x1xf32>
    %243 = tpu.reciprocal %242 {approx = true} : vector<8x1xf32> -> vector<8x1xf32>
    %244 = arith.mulf %242, %243 : vector<8x1xf32>
    %cst_84 = arith.constant 2.000000e+00 : f32
    %245 = vector.broadcast %cst_84 : f32 to vector<8x1xf32>
    %246 = arith.subf %245, %244 : vector<8x1xf32>
    %247 = arith.mulf %243, %246 : vector<8x1xf32>
    %248 = vector.broadcast %247 : vector<8x1xf32> to vector<8x8xf32>
    %249 = arith.mulf %240, %248 : vector<8x8xf32>
    %c0_85 = arith.constant 0 : index
    %c0_86 = arith.constant 0 : index
    %c80 = arith.constant 80 : index
    %250 = vector.load %arg2[%c0_85, %c0_86, %c80] : memref<1x8x96xf32, #tpu.memory_space<vmem>>, vector<1x8x8xf32>
    %251 = vector.shape_cast %250 : vector<1x8x8xf32> to vector<8x8xf32>
    %252 = tpu.concatenate %251, %61 in 1 : vector<8x8xf32>, vector<8x1xf32> -> vector<8x9xf32>
    %c2 = arith.constant 2 : index
    %c0_87 = arith.constant 0 : index
    %c0_88 = arith.constant 0 : index
    %253 = vector.load %arg5[%c2, %c0_87, %c0_88] : memref<4x8x9xf32, #tpu.memory_space<vmem>>, vector<1x8x9xf32>
    %254 = vector.shape_cast %253 : vector<1x8x9xf32> to vector<8x9xf32>
    %cst_89 = arith.constant dense<0.000000e+00> : vector<8x8xf32>
    %255 = tpu.matmul %226, %249, %cst_89 {dimension_numbers = #tpu.dot_dimension_numbers<[1], [1], [0], [0], [0, 0, 1, 0], [], []>} : vector<8x8xf32>, vector<8x8xf32>, vector<8x8xf32> -> vector<8x8xf32>
    %cst_90 = arith.constant 0.000000e+00 : f32
    %256 = vector.broadcast %cst_90 : f32 to vector<8x8xf32>
    %257 = arith.select %60, %255, %256 : vector<8x8xi1>, vector<8x8xf32>
    %cst_91 = arith.constant dense<0.000000e+00> : vector<8x9xf32>
    %258 = tpu.matmul %257, %252, %cst_91 {dimension_numbers = #tpu.dot_dimension_numbers<[1], [0], [0], [1], [0, 0, 1, 1], [], []>} : vector<8x8xf32>, vector<8x9xf32>, vector<8x9xf32> -> vector<8x9xf32>
    %cst_92 = arith.constant dense<0.000000e+00> : vector<8x9xf32>
    %259 = tpu.matmul %226, %254, %cst_92 {dimension_numbers = #tpu.dot_dimension_numbers<[1], [0], [0], [1], [0, 0, 1, 1], [], []>} : vector<8x8xf32>, vector<8x9xf32>, vector<8x9xf32> -> vector<8x9xf32>
    %260 = arith.addf %258, %259 : vector<8x9xf32>
    %cst_93 = arith.constant dense<0.000000e+00> : vector<8x9xf32>
    %261 = tpu.matmul %249, %252, %cst_93 {dimension_numbers = #tpu.dot_dimension_numbers<[0], [0], [1], [1], [0, 1, 1, 1], [], []>} : vector<8x8xf32>, vector<8x9xf32>, vector<8x9xf32> -> vector<8x9xf32>
    %262 = arith.addf %254, %261 : vector<8x9xf32>
    %c2_94 = arith.constant 2 : index
    %c0_95 = arith.constant 0 : index
    %c0_96 = arith.constant 0 : index
    %263 = vector.load %arg5[%c2_94, %c0_95, %c0_96] : memref<4x8x9xf32, #tpu.memory_space<vmem>>, vector<1x8x9xf32>
    %264 = vector.shape_cast %263 : vector<1x8x9xf32> to vector<8x9xf32>
    %265 = vector.shape_cast %262 : vector<8x9xf32> to vector<1x8x9xf32>
    tpu.vector_store %arg5[%c2_94, %c0_95, %c0_96], %265 {strides = array<i32>} : memref<4x8x9xf32, #tpu.memory_space<vmem>>, vector<1x8x9xf32>,
    %266 = vector.extract_strided_slice %260 {offsets = [0, 0], sizes = [8, 8], strides = [1, 1]} : vector<8x9xf32> to vector<8x8xf32>
    %267 = vector.extract_strided_slice %260 {offsets = [0, 8], sizes = [8, 1], strides = [1, 1]} : vector<8x9xf32> to vector<8x1xf32>
    %268 = tpu.reciprocal %267 {approx = true} : vector<8x1xf32> -> vector<8x1xf32>
    %269 = arith.mulf %267, %268 : vector<8x1xf32>
    %cst_97 = arith.constant 2.000000e+00 : f32
    %270 = vector.broadcast %cst_97 : f32 to vector<8x1xf32>
    %271 = arith.subf %270, %269 : vector<8x1xf32>
    %272 = arith.mulf %268, %271 : vector<8x1xf32>
    %273 = vector.broadcast %272 : vector<8x1xf32> to vector<8x8xf32>
    %274 = arith.mulf %266, %273 : vector<8x8xf32>
    %c0_98 = arith.constant 0 : index
    %c0_99 = arith.constant 0 : index
    %c24 = arith.constant 24 : index
    %275 = vector.load %arg2[%c0_98, %c0_99, %c24] : memref<1x8x96xf32, #tpu.memory_space<vmem>>, vector<1x8x8xf32>
    %276 = vector.shape_cast %275 : vector<1x8x8xf32> to vector<8x8xf32>
    %277 = vector.extract_strided_slice %276 {offsets = [0, 0], sizes = [8, 4], strides = [1, 1]} : vector<8x8xf32> to vector<8x4xf32>
    %278 = arith.mulf %277, %3 : vector<8x4xf32>
    %cst_100 = arith.constant dense<0.000000e+00> : vector<8x4xf32>
    %279 = tpu.matmul %277, %57, %cst_100 {dimension_numbers = #tpu.dot_dimension_numbers<[1], [0], [0], [1], [0, 0, 1, 1], [], []>} : vector<8x4xf32>, vector<4x4xf32>, vector<8x4xf32> -> vector<8x4xf32>
    %280 = arith.mulf %279, %4 : vector<8x4xf32>
    %281 = arith.addf %278, %280 : vector<8x4xf32>
    %282 = vector.extract_strided_slice %276 {offsets = [0, 4], sizes = [8, 4], strides = [1, 1]} : vector<8x8xf32> to vector<8x4xf32>
    %283 = tpu.concatenate %281, %282 in 1 : vector<8x4xf32>, vector<8x4xf32> -> vector<8x8xf32>
    %cst_101 = arith.constant dense<0xFF800000> : vector<8xf32>
    %284 = vector.multi_reduction <maximumf>, %283, %cst_101 [1] : vector<8x8xf32> to vector<8xf32>
    %285 = vector.shape_cast %284 : vector<8xf32> to vector<8x1xf32>
    %286 = vector.broadcast %285 : vector<8x1xf32> to vector<8x8xf32>
    %287 = arith.subf %283, %286 : vector<8x8xf32>
    %288 = math.exp %287 : vector<8x8xf32>
    %cst_102 = arith.constant dense<0.000000e+00> : vector<8xf32>
    %289 = vector.multi_reduction <add>, %288, %cst_102 [1] : vector<8x8xf32> to vector<8xf32>
    %290 = vector.shape_cast %289 : vector<8xf32> to vector<8x1xf32>
    %291 = tpu.reciprocal %290 {approx = true} : vector<8x1xf32> -> vector<8x1xf32>
    %292 = arith.mulf %290, %291 : vector<8x1xf32>
    %cst_103 = arith.constant 2.000000e+00 : f32
    %293 = vector.broadcast %cst_103 : f32 to vector<8x1xf32>
    %294 = arith.subf %293, %292 : vector<8x1xf32>
    %295 = arith.mulf %291, %294 : vector<8x1xf32>
    %296 = vector.broadcast %295 : vector<8x1xf32> to vector<8x8xf32>
    %297 = arith.mulf %288, %296 : vector<8x8xf32>
    %c0_104 = arith.constant 0 : index
    %c0_105 = arith.constant 0 : index
    %c56 = arith.constant 56 : index
    %298 = vector.load %arg2[%c0_104, %c0_105, %c56] : memref<1x8x96xf32, #tpu.memory_space<vmem>>, vector<1x8x8xf32>
    %299 = vector.shape_cast %298 : vector<1x8x8xf32> to vector<8x8xf32>
    %300 = vector.extract_strided_slice %299 {offsets = [0, 0], sizes = [8, 4], strides = [1, 1]} : vector<8x8xf32> to vector<8x4xf32>
    %301 = arith.mulf %300, %3 : vector<8x4xf32>
    %cst_106 = arith.constant dense<0.000000e+00> : vector<8x4xf32>
    %302 = tpu.matmul %300, %57, %cst_106 {dimension_numbers = #tpu.dot_dimension_numbers<[1], [0], [0], [1], [0, 0, 1, 1], [], []>} : vector<8x4xf32>, vector<4x4xf32>, vector<8x4xf32> -> vector<8x4xf32>
    %303 = arith.mulf %302, %4 : vector<8x4xf32>
    %304 = arith.addf %301, %303 : vector<8x4xf32>
    %305 = vector.extract_strided_slice %299 {offsets = [0, 4], sizes = [8, 4], strides = [1, 1]} : vector<8x8xf32> to vector<8x4xf32>
    %306 = tpu.concatenate %304, %305 in 1 : vector<8x4xf32>, vector<8x4xf32> -> vector<8x8xf32>
    %cst_107 = arith.constant dense<0xFF800000> : vector<8xf32>
    %307 = vector.multi_reduction <maximumf>, %306, %cst_107 [1] : vector<8x8xf32> to vector<8xf32>
    %308 = vector.shape_cast %307 : vector<8xf32> to vector<8x1xf32>
    %309 = vector.broadcast %308 : vector<8x1xf32> to vector<8x8xf32>
    %310 = arith.subf %306, %309 : vector<8x8xf32>
    %311 = math.exp %310 : vector<8x8xf32>
    %cst_108 = arith.constant dense<0.000000e+00> : vector<8xf32>
    %312 = vector.multi_reduction <add>, %311, %cst_108 [1] : vector<8x8xf32> to vector<8xf32>
    %313 = vector.shape_cast %312 : vector<8xf32> to vector<8x1xf32>
    %314 = tpu.reciprocal %313 {approx = true} : vector<8x1xf32> -> vector<8x1xf32>
    %315 = arith.mulf %313, %314 : vector<8x1xf32>
    %cst_109 = arith.constant 2.000000e+00 : f32
    %316 = vector.broadcast %cst_109 : f32 to vector<8x1xf32>
    %317 = arith.subf %316, %315 : vector<8x1xf32>
    %318 = arith.mulf %314, %317 : vector<8x1xf32>
    %319 = vector.broadcast %318 : vector<8x1xf32> to vector<8x8xf32>
    %320 = arith.mulf %311, %319 : vector<8x8xf32>
    %c0_110 = arith.constant 0 : index
    %c0_111 = arith.constant 0 : index
    %c88 = arith.constant 88 : index
    %321 = vector.load %arg2[%c0_110, %c0_111, %c88] : memref<1x8x96xf32, #tpu.memory_space<vmem>>, vector<1x8x8xf32>
    %322 = vector.shape_cast %321 : vector<1x8x8xf32> to vector<8x8xf32>
    %323 = tpu.concatenate %322, %61 in 1 : vector<8x8xf32>, vector<8x1xf32> -> vector<8x9xf32>
    %c3 = arith.constant 3 : index
    %c0_112 = arith.constant 0 : index
    %c0_113 = arith.constant 0 : index
    %324 = vector.load %arg5[%c3, %c0_112, %c0_113] : memref<4x8x9xf32, #tpu.memory_space<vmem>>, vector<1x8x9xf32>
    %325 = vector.shape_cast %324 : vector<1x8x9xf32> to vector<8x9xf32>
    %cst_114 = arith.constant dense<0.000000e+00> : vector<8x8xf32>
    %326 = tpu.matmul %297, %320, %cst_114 {dimension_numbers = #tpu.dot_dimension_numbers<[1], [1], [0], [0], [0, 0, 1, 0], [], []>} : vector<8x8xf32>, vector<8x8xf32>, vector<8x8xf32> -> vector<8x8xf32>
    %cst_115 = arith.constant 0.000000e+00 : f32
    %327 = vector.broadcast %cst_115 : f32 to vector<8x8xf32>
    %328 = arith.select %60, %326, %327 : vector<8x8xi1>, vector<8x8xf32>
    %cst_116 = arith.constant dense<0.000000e+00> : vector<8x9xf32>
    %329 = tpu.matmul %328, %323, %cst_116 {dimension_numbers = #tpu.dot_dimension_numbers<[1], [0], [0], [1], [0, 0, 1, 1], [], []>} : vector<8x8xf32>, vector<8x9xf32>, vector<8x9xf32> -> vector<8x9xf32>
    %cst_117 = arith.constant dense<0.000000e+00> : vector<8x9xf32>
    %330 = tpu.matmul %297, %325, %cst_117 {dimension_numbers = #tpu.dot_dimension_numbers<[1], [0], [0], [1], [0, 0, 1, 1], [], []>} : vector<8x8xf32>, vector<8x9xf32>, vector<8x9xf32> -> vector<8x9xf32>
    %331 = arith.addf %329, %330 : vector<8x9xf32>
    %cst_118 = arith.constant dense<0.000000e+00> : vector<8x9xf32>
    %332 = tpu.matmul %320, %323, %cst_118 {dimension_numbers = #tpu.dot_dimension_numbers<[0], [0], [1], [1], [0, 1, 1, 1], [], []>} : vector<8x8xf32>, vector<8x9xf32>, vector<8x9xf32> -> vector<8x9xf32>
    %333 = arith.addf %325, %332 : vector<8x9xf32>
    %c3_119 = arith.constant 3 : index
    %c0_120 = arith.constant 0 : index
    %c0_121 = arith.constant 0 : index
    %334 = vector.load %arg5[%c3_119, %c0_120, %c0_121] : memref<4x8x9xf32, #tpu.memory_space<vmem>>, vector<1x8x9xf32>
    %335 = vector.shape_cast %334 : vector<1x8x9xf32> to vector<8x9xf32>
    %336 = vector.shape_cast %333 : vector<8x9xf32> to vector<1x8x9xf32>
    tpu.vector_store %arg5[%c3_119, %c0_120, %c0_121], %336 {strides = array<i32>} : memref<4x8x9xf32, #tpu.memory_space<vmem>>, vector<1x8x9xf32>,
    %337 = vector.extract_strided_slice %331 {offsets = [0, 0], sizes = [8, 8], strides = [1, 1]} : vector<8x9xf32> to vector<8x8xf32>
    %338 = vector.extract_strided_slice %331 {offsets = [0, 8], sizes = [8, 1], strides = [1, 1]} : vector<8x9xf32> to vector<8x1xf32>
    %339 = tpu.reciprocal %338 {approx = true} : vector<8x1xf32> -> vector<8x1xf32>
    %340 = arith.mulf %338, %339 : vector<8x1xf32>
    %cst_122 = arith.constant 2.000000e+00 : f32
    %341 = vector.broadcast %cst_122 : f32 to vector<8x1xf32>
    %342 = arith.subf %341, %340 : vector<8x1xf32>
    %343 = arith.mulf %339, %342 : vector<8x1xf32>
    %344 = vector.broadcast %343 : vector<8x1xf32> to vector<8x8xf32>
    %345 = arith.mulf %337, %344 : vector<8x8xf32>
    %346 = tpu.concatenate %132, %203, %274, %345 in 1 : vector<8x8xf32>, vector<8x8xf32>, vector<8x8xf32>, vector<8x8xf32> -> vector<8x32xf32>
    %c0_123 = arith.constant 0 : index
    %c0_124 = arith.constant 0 : index
    %c0_125 = arith.constant 0 : index
    %347 = vector.load %arg4[%c0_123, %c0_124, %c0_125] : memref<1x8x32xf32, #tpu.memory_space<vmem>>, vector<1x8x32xf32>
    %348 = vector.shape_cast %347 : vector<1x8x32xf32> to vector<8x32xf32>
    %349 = vector.shape_cast %346 : vector<8x32xf32> to vector<1x8x32xf32>
    tpu.vector_store %arg4[%c0_123, %c0_124, %c0_125], %349 {strides = array<i32>} : memref<1x8x32xf32, #tpu.memory_space<vmem>>, vector<1x8x32xf32>,
    return
  }
  func.func @transform_0(%arg0: i32, %arg1: i32) -> (i32, i32, i32) {
    %c0_i32 = arith.constant 0 : i32
    %c0_i32_0 = arith.constant 0 : i32
    return %arg0, %arg1, %c0_i32 : i32, i32, i32
  }
  func.func @transform_1(%arg0: i32, %arg1: i32) -> (i32, i32) {
    %c0_i32 = arith.constant 0 : i32
    %c0_i32_0 = arith.constant 0 : i32
    return %arg1, %c0_i32 : i32, i32
  }
  func.func @transform_2(%arg0: i32, %arg1: i32) -> (i32, i32, i32) {
    %c0_i32 = arith.constant 0 : i32
    %c0_i32_0 = arith.constant 0 : i32
    return %arg0, %arg1, %c0_i32 : i32, i32, i32
  }
}

module attributes {stable_mosaic.version = 11 : i64} {
  func.func @_linear_kernel(%arg0: i32, %arg1: i32, %arg2: i32, %arg3: memref<16x32xf32, #tpu.memory_space<vmem>>, %arg4: memref<32x64xf32, #tpu.memory_space<vmem>>, %arg5: memref<1x64xf32, #tpu.memory_space<vmem>>, %arg6: memref<16x64xf32, #tpu.memory_space<vmem>>, %arg7: memref<16x64xf32, #tpu.memory_space<vmem>>) attributes {dimension_semantics = [#tpu.dimension_semantics<parallel>, #tpu.dimension_semantics<parallel>, #tpu.dimension_semantics<arbitrary>], iteration_bounds = array<i64: 1, 1, 1>, scalar_prefetch = 0 : i64, scratch_operands = 1 : i64, tpu.core_type = #tpu.core_type<tc>, window_params = [{transform_indices = @transform_0, window_bounds = array<i64: 16, 32>}, {transform_indices = @transform_1, window_bounds = array<i64: 32, 64>}, {transform_indices = @transform_2, window_bounds = array<i64: 1, 64>}, {transform_indices = @transform_3, window_bounds = array<i64: 16, 64>}]} {
    %c0_i32 = arith.constant 0 : i32
    %0 = arith.cmpi eq, %arg2, %c0_i32 : i32
    %1 = arith.extui %0 : i1 to i32
    %c0_i32_0 = arith.constant 0 : i32
    %2 = arith.cmpi ne, %1, %c0_i32_0 : i32
    scf.if %2 {
      %cst_10 = arith.constant 0.000000e+00 : f32
      %12 = vector.broadcast %cst_10 : f32 to vector<16x64xf32>
      %c0_11 = arith.constant 0 : index
      %c0_12 = arith.constant 0 : index
      %13 = vector.load %arg7[%c0_11, %c0_12] : memref<16x64xf32, #tpu.memory_space<vmem>>, vector<16x64xf32>
      tpu.vector_store %arg7[%c0_11, %c0_12], %12 {strides = array<i32>} : memref<16x64xf32, #tpu.memory_space<vmem>>, vector<16x64xf32>,
    } else {
    }
    %c0 = arith.constant 0 : index
    %c0_1 = arith.constant 0 : index
    %3 = vector.load %arg3[%c0, %c0_1] : memref<16x32xf32, #tpu.memory_space<vmem>>, vector<16x32xf32>
    %c0_2 = arith.constant 0 : index
    %c0_3 = arith.constant 0 : index
    %4 = vector.load %arg4[%c0_2, %c0_3] : memref<32x64xf32, #tpu.memory_space<vmem>>, vector<32x64xf32>
    %c0_4 = arith.constant 0 : index
    %c0_5 = arith.constant 0 : index
    %5 = vector.load %arg7[%c0_4, %c0_5] : memref<16x64xf32, #tpu.memory_space<vmem>>, vector<16x64xf32>
    %cst = arith.constant dense<0.000000e+00> : vector<16x64xf32>
    %6 = tpu.matmul %3, %4, %cst {dimension_numbers = #tpu.dot_dimension_numbers<[1], [0], [0], [1], [0, 0, 1, 1], [], []>} : vector<16x32xf32>, vector<32x64xf32>, vector<16x64xf32> -> vector<16x64xf32>
    %7 = arith.addf %5, %6 : vector<16x64xf32>
    %c0_6 = arith.constant 0 : index
    %c0_7 = arith.constant 0 : index
    %8 = vector.load %arg7[%c0_6, %c0_7] : memref<16x64xf32, #tpu.memory_space<vmem>>, vector<16x64xf32>
    tpu.vector_store %arg7[%c0_6, %c0_7], %7 {strides = array<i32>} : memref<16x64xf32, #tpu.memory_space<vmem>>, vector<16x64xf32>,
    %c0_i32_8 = arith.constant 0 : i32
    %9 = arith.cmpi eq, %arg2, %c0_i32_8 : i32
    %10 = arith.extui %9 : i1 to i32
    %c0_i32_9 = arith.constant 0 : i32
    %11 = arith.cmpi ne, %10, %c0_i32_9 : i32
    scf.if %11 {
      %c0_10 = arith.constant 0 : index
      %c0_11 = arith.constant 0 : index
      %12 = vector.load %arg7[%c0_10, %c0_11] : memref<16x64xf32, #tpu.memory_space<vmem>>, vector<16x64xf32>
      %c0_12 = arith.constant 0 : index
      %c0_13 = arith.constant 0 : index
      %13 = vector.load %arg5[%c0_12, %c0_13] : memref<1x64xf32, #tpu.memory_space<vmem>>, vector<1x64xf32>
      %14 = vector.broadcast %13 : vector<1x64xf32> to vector<16x64xf32>
      %15 = arith.addf %12, %14 : vector<16x64xf32>
      %cst_14 = arith.constant 0.000000e+00 : f32
      %16 = vector.broadcast %cst_14 : f32 to vector<16x64xf32>
      %17 = arith.maximumf %15, %16 : vector<16x64xf32>
      %c0_15 = arith.constant 0 : index
      %c0_16 = arith.constant 0 : index
      %18 = vector.load %arg6[%c0_15, %c0_16] : memref<16x64xf32, #tpu.memory_space<vmem>>, vector<16x64xf32>
      tpu.vector_store %arg6[%c0_15, %c0_16], %17 {strides = array<i32>} : memref<16x64xf32, #tpu.memory_space<vmem>>, vector<16x64xf32>,
    } else {
    }
    return
  }
  func.func @transform_0(%arg0: i32, %arg1: i32, %arg2: i32) -> (i32, i32) {
    %c0_i32 = arith.constant 0 : i32
    return %arg0, %arg2 : i32, i32
  }
  func.func @transform_1(%arg0: i32, %arg1: i32, %arg2: i32) -> (i32, i32) {
    %c0_i32 = arith.constant 0 : i32
    return %arg2, %arg1 : i32, i32
  }
  func.func @transform_2(%arg0: i32, %arg1: i32, %arg2: i32) -> (i32, i32) {
    %c0_i32 = arith.constant 0 : i32
    %c0_i32_0 = arith.constant 0 : i32
    return %c0_i32, %arg1 : i32, i32
  }
  func.func @transform_3(%arg0: i32, %arg1: i32, %arg2: i32) -> (i32, i32) {
    %c0_i32 = arith.constant 0 : i32
    return %arg0, %arg1 : i32, i32
  }
}

module attributes {stable_mosaic.version = 11 : i64} {
  func.func @_linear_kernel(%arg0: i32, %arg1: i32, %arg2: i32, %arg3: memref<16x64xf32, #tpu.memory_space<vmem>>, %arg4: memref<64x32xf32, #tpu.memory_space<vmem>>, %arg5: memref<1x32xf32, #tpu.memory_space<vmem>>, %arg6: memref<16x32xf32, #tpu.memory_space<vmem>>, %arg7: memref<16x32xf32, #tpu.memory_space<vmem>>) attributes {dimension_semantics = [#tpu.dimension_semantics<parallel>, #tpu.dimension_semantics<parallel>, #tpu.dimension_semantics<arbitrary>], iteration_bounds = array<i64: 1, 1, 1>, scalar_prefetch = 0 : i64, scratch_operands = 1 : i64, tpu.core_type = #tpu.core_type<tc>, window_params = [{transform_indices = @transform_0, window_bounds = array<i64: 16, 64>}, {transform_indices = @transform_1, window_bounds = array<i64: 64, 32>}, {transform_indices = @transform_2, window_bounds = array<i64: 1, 32>}, {transform_indices = @transform_3, window_bounds = array<i64: 16, 32>}]} {
    %c0_i32 = arith.constant 0 : i32
    %0 = arith.cmpi eq, %arg2, %c0_i32 : i32
    %1 = arith.extui %0 : i1 to i32
    %c0_i32_0 = arith.constant 0 : i32
    %2 = arith.cmpi ne, %1, %c0_i32_0 : i32
    scf.if %2 {
      %cst_10 = arith.constant 0.000000e+00 : f32
      %12 = vector.broadcast %cst_10 : f32 to vector<16x32xf32>
      %c0_11 = arith.constant 0 : index
      %c0_12 = arith.constant 0 : index
      %13 = vector.load %arg7[%c0_11, %c0_12] : memref<16x32xf32, #tpu.memory_space<vmem>>, vector<16x32xf32>
      tpu.vector_store %arg7[%c0_11, %c0_12], %12 {strides = array<i32>} : memref<16x32xf32, #tpu.memory_space<vmem>>, vector<16x32xf32>,
    } else {
    }
    %c0 = arith.constant 0 : index
    %c0_1 = arith.constant 0 : index
    %3 = vector.load %arg3[%c0, %c0_1] : memref<16x64xf32, #tpu.memory_space<vmem>>, vector<16x64xf32>
    %c0_2 = arith.constant 0 : index
    %c0_3 = arith.constant 0 : index
    %4 = vector.load %arg4[%c0_2, %c0_3] : memref<64x32xf32, #tpu.memory_space<vmem>>, vector<64x32xf32>
    %c0_4 = arith.constant 0 : index
    %c0_5 = arith.constant 0 : index
    %5 = vector.load %arg7[%c0_4, %c0_5] : memref<16x32xf32, #tpu.memory_space<vmem>>, vector<16x32xf32>
    %cst = arith.constant dense<0.000000e+00> : vector<16x32xf32>
    %6 = tpu.matmul %3, %4, %cst {dimension_numbers = #tpu.dot_dimension_numbers<[1], [0], [0], [1], [0, 0, 1, 1], [], []>} : vector<16x64xf32>, vector<64x32xf32>, vector<16x32xf32> -> vector<16x32xf32>
    %7 = arith.addf %5, %6 : vector<16x32xf32>
    %c0_6 = arith.constant 0 : index
    %c0_7 = arith.constant 0 : index
    %8 = vector.load %arg7[%c0_6, %c0_7] : memref<16x32xf32, #tpu.memory_space<vmem>>, vector<16x32xf32>
    tpu.vector_store %arg7[%c0_6, %c0_7], %7 {strides = array<i32>} : memref<16x32xf32, #tpu.memory_space<vmem>>, vector<16x32xf32>,
    %c0_i32_8 = arith.constant 0 : i32
    %9 = arith.cmpi eq, %arg2, %c0_i32_8 : i32
    %10 = arith.extui %9 : i1 to i32
    %c0_i32_9 = arith.constant 0 : i32
    %11 = arith.cmpi ne, %10, %c0_i32_9 : i32
    scf.if %11 {
      %c0_10 = arith.constant 0 : index
      %c0_11 = arith.constant 0 : index
      %12 = vector.load %arg7[%c0_10, %c0_11] : memref<16x32xf32, #tpu.memory_space<vmem>>, vector<16x32xf32>
      %c0_12 = arith.constant 0 : index
      %c0_13 = arith.constant 0 : index
      %13 = vector.load %arg5[%c0_12, %c0_13] : memref<1x32xf32, #tpu.memory_space<vmem>>, vector<1x32xf32>
      %14 = vector.broadcast %13 : vector<1x32xf32> to vector<16x32xf32>
      %15 = arith.addf %12, %14 : vector<16x32xf32>
      %c0_14 = arith.constant 0 : index
      %c0_15 = arith.constant 0 : index
      %16 = vector.load %arg6[%c0_14, %c0_15] : memref<16x32xf32, #tpu.memory_space<vmem>>, vector<16x32xf32>
      tpu.vector_store %arg6[%c0_14, %c0_15], %15 {strides = array<i32>} : memref<16x32xf32, #tpu.memory_space<vmem>>, vector<16x32xf32>,
    } else {
    }
    return
  }
  func.func @transform_0(%arg0: i32, %arg1: i32, %arg2: i32) -> (i32, i32) {
    %c0_i32 = arith.constant 0 : i32
    return %arg0, %arg2 : i32, i32
  }
  func.func @transform_1(%arg0: i32, %arg1: i32, %arg2: i32) -> (i32, i32) {
    %c0_i32 = arith.constant 0 : i32
    return %arg2, %arg1 : i32, i32
  }
  func.func @transform_2(%arg0: i32, %arg1: i32, %arg2: i32) -> (i32, i32) {
    %c0_i32 = arith.constant 0 : i32
    %c0_i32_0 = arith.constant 0 : i32
    return %c0_i32, %arg1 : i32, i32
  }
  func.func @transform_3(%arg0: i32, %arg1: i32, %arg2: i32) -> (i32, i32) {
    %c0_i32 = arith.constant 0 : i32
    return %arg0, %arg1 : i32, i32
  }
}

</mosaic_0001>

<bundles_post_ra>
// kernel: ortho_linear_transformer.12
= control target key start
LH: loop header
LB: loop body
LE: loop exit
PB: predicated region body
PF: predicated region fallthrough
CT: control target
= control target key end

     0   :  { %vm18_vm0 = vcmask 261120   ;;  %v88_v2 = vmov 0.0   ;;  %s144_s1 = inlined_call_operand.vmem [shape: f32[32,32], index: 1, kind: input, shape index: {}]   ;;  %s145_s2 = inlined_call_operand.vmem [shape: f32[1,32], index: 2, kind: input, shape index: {}]   ;;  %s146_s0 = inlined_call_operand.vmem [shape: f32[16,32], index: 0, kind: input, shape index: {}]   ;;  %s147_s3 = inlined_call_operand.vmem [shape: f32[16,32], index: 3, kind: output, shape index: {}]  }
   0x1   :  { %v26_v0 = vld [vmem:[%s144_s1 + $0x18] sm:$0xff]  ;;  %v25_v1 = vld [vmem:[%s144_s1 + $0x10] sm:$0xff]  ;;  %19 = vst.msk [vmem:[#allocation2] sm:$0xff] %vm18_vm0, %v88_v2  ;;  %v24_v3 = vld [vmem:[%s144_s1 + $0x8] sm:$0xff] }
   0x2   :  { %48 = vmatpush.msra.mxu0 %v26_v0  ;;  %82 = vmatpush.msra.mxu1 %v26_v0  ;;  %20 = vst.msk [vmem:[#allocation2 + $0x8] sm:$0xff] %vm18_vm0, %v88_v2  ;;  %v23_v4 = vld [vmem:[%s144_s1] sm:$0xff]  ;;  %v22_v6 = vld [vmem:[%s146_s0 + $0x8] sm:$0xff] }
   0x3   :  { %v21_v5 = vld [vmem:[%s146_s0] sm:$0xff] }
   0x4   :  { %49 = vmatpush.msra.mxu0 %v25_v1  ;;  %83 = vmatpush.msra.mxu1 %v25_v1  ;;  %v87_v13 = vld [vmem:[%s145_s2] ss:$0 sm:$0xff] }
   0x6   :  { %50 = vmatpush.msra.mxu0 %v24_v3  ;;  %84 = vmatpush.msra.mxu1 %v24_v3 }
   0x8   :  { %51 = vmatpush.msra.mxu0 %v23_v4  ;;  %85 = vmatpush.msra.mxu1 %v23_v4  ;;  %v27_v7 = vld [vmem:[#allocation2] sm:$0xff] }
   0x9   :  { %80 = vmatmul.msk.f32.vlgmr.msra.gmra.mxu0 %vm18_vm0, %v21_v5  ;;  %81 = vmatmul.msk.f32.vlgmr.msra.gmra.mxu1 %vm18_vm0, %v22_v6  ;;  %v28_v8 = vld [vmem:[#allocation2 + $0x8] sm:$0xff] }
  0x86   :  { %v53_v9 = vpop.f32.mrf.mxu0  ;;  %v56_v10 = vpop.f32.mrf.mxu1 }
  0x87   :  { %v59_v11 = vadd.f32 %v53_v9, %v27_v7  ;;  %v60_v12 = vadd.f32 %v56_v10, %v28_v8 }
  0x89   :  { %61 = vst.msk [vmem:[#allocation2] sm:$0xff] %vm18_vm0, %v59_v11 }
  0x8a   :  { %62 = vst.msk [vmem:[#allocation2 + $0x8] sm:$0xff] %vm18_vm0, %v60_v12 }
  0x90   :  { %v66_v14 = vld [vmem:[#allocation2] sm:$0xff] }
  0x91   :  { %v72_v15 = vadd.f32 %v87_v13, %v66_v14  ;;  %v67_v16 = vld [vmem:[#allocation2 + $0x8] sm:$0xff] }
  0x92   :  { %v73_v17 = vadd.f32 %v87_v13, %v67_v16 }
  0x93   :  { %74 = vst.msk [vmem:[%s147_s3] sm:$0xff] %vm18_vm0, %v72_v15 }
  0x94   :  { %75 = vst.msk [vmem:[%s147_s3 + $0x8] sm:$0xff] %vm18_vm0, %v73_v17 }

// kernel: ortho_linear_transformer.10
= control target key start
LH: loop header
LB: loop body
LE: loop exit
PB: predicated region body
PF: predicated region fallthrough
CT: control target
= control target key end

     0   :  { %vm18_vm0 = vcmask 785408   ;;  %v89_v2 = vmov 0.0   ;;  %vm29_vm1 = vcmask 261120   ;;  %s143_s1 = inlined_call_operand.vmem [shape: f32[32,96], index: 1, kind: input, shape index: {}]   ;;  %s144_s2 = inlined_call_operand.vmem [shape: f32[1,96], index: 2, kind: input, shape index: {}]   ;;  %s145_s0 = inlined_call_operand.vmem [shape: f32[16,32], index: 0, kind: input, shape index: {}]   ;;  %s146_s3 = inlined_call_operand.vmem [shape: f32[16,96], index: 3, kind: output, shape index: {}]  }
   0x1   :  { %v26_v0 = vld [vmem:[%s143_s1 + $0x18] sm:$0xff]  ;;  %v25_v1 = vld [vmem:[%s143_s1 + $0x10] sm:$0xff]  ;;  %19 = vst.msk [vmem:[#allocation2] sm:$0xff] %vm18_vm0, %v89_v2  ;;  %v24_v3 = vld [vmem:[%s143_s1 + $0x8] sm:$0xff] }
   0x2   :  { %48 = vmatpush.msra.mxu0 %v26_v0  ;;  %83 = vmatpush.msra.mxu1 %v26_v0  ;;  %20 = vst.msk [vmem:[#allocation2 + $0x8] sm:$0xff] %vm18_vm0, %v89_v2  ;;  %v23_v4 = vld [vmem:[%s143_s1] sm:$0xff]  ;;  %v22_v6 = vld [vmem:[%s145_s0 + $0x8] sm:$0xff] }
   0x3   :  { %v21_v5 = vld [vmem:[%s145_s0] sm:$0xff] }
   0x4   :  { %49 = vmatpush.msra.mxu0 %v25_v1  ;;  %84 = vmatpush.msra.mxu1 %v25_v1  ;;  %v88_v13 = vld [vmem:[%s144_s2] ss:$0 sm:$0xff] }
   0x6   :  { %50 = vmatpush.msra.mxu0 %v24_v3  ;;  %85 = vmatpush.msra.mxu1 %v24_v3 }
   0x8   :  { %51 = vmatpush.msra.mxu0 %v23_v4  ;;  %86 = vmatpush.msra.mxu1 %v23_v4  ;;  %v27_v7 = vld [vmem:[#allocation2] sm:$0xff] }
   0x9   :  { %81 = vmatmul.msk.f32.vlgmr.msra.gmra.mxu0 %vm29_vm1, %v21_v5  ;;  %82 = vmatmul.msk.f32.vlgmr.msra.gmra.mxu1 %vm29_vm1, %v22_v6  ;;  %v28_v8 = vld [vmem:[#allocation2 + $0x8] sm:$0xff] }
  0x86   :  { %v53_v9 = vpop.f32.mrf.mxu0  ;;  %v56_v10 = vpop.f32.mrf.mxu1 }
  0x87   :  { %v59_v11 = vadd.f32 %v53_v9, %v27_v7  ;;  %v60_v12 = vadd.f32 %v56_v10, %v28_v8 }
  0x89   :  { %62 = vst.msk [vmem:[#allocation2] sm:$0xff] %vm18_vm0, %v59_v11 }
  0x8a   :  { %63 = vst.msk [vmem:[#allocation2 + $0x8] sm:$0xff] %vm18_vm0, %v60_v12 }
  0x90   :  { %v67_v14 = vld [vmem:[#allocation2] sm:$0xff] }
  0x91   :  { %v73_v15 = vadd.f32 %v88_v13, %v67_v14  ;;  %v68_v16 = vld [vmem:[#allocation2 + $0x8] sm:$0xff] }
  0x92   :  { %v74_v17 = vadd.f32 %v88_v13, %v68_v16 }
  0x93   :  { %75 = vst.msk [vmem:[%s146_s3] sm:$0xff] %vm18_vm0, %v73_v15 }
  0x94   :  { %76 = vst.msk [vmem:[%s146_s3 + $0x8] sm:$0xff] %vm18_vm0, %v74_v17 }

// kernel: ortho_linear_transformer.13
= control target key start
LH: loop header
LB: loop body
LE: loop exit
PB: predicated region body
PF: predicated region fallthrough
CT: control target
= control target key end

     0   :  { %vm18_vm0 = vcmask 523264   ;;  %v91_v2 = vmov 0.0   ;;  %vm29_vm1 = vcmask 261120   ;;  %s145_s1 = inlined_call_operand.vmem [shape: f32[32,64], index: 1, kind: input, shape index: {}]   ;;  %s146_s2 = inlined_call_operand.vmem [shape: f32[1,64], index: 2, kind: input, shape index: {}]   ;;  %s147_s0 = inlined_call_operand.vmem [shape: f32[16,32], index: 0, kind: input, shape index: {}]   ;;  %s148_s3 = inlined_call_operand.vmem [shape: f32[16,64], index: 3, kind: output, shape index: {}]  }
   0x1   :  { %v26_v0 = vld [vmem:[%s145_s1 + $0x18] sm:$0xff]  ;;  %v25_v1 = vld [vmem:[%s145_s1 + $0x10] sm:$0xff]  ;;  %19 = vst.msk [vmem:[#allocation2] sm:$0xff] %vm18_vm0, %v91_v2  ;;  %v24_v3 = vld [vmem:[%s145_s1 + $0x8] sm:$0xff] }
   0x2   :  { %48 = vmatpush.msra.mxu0 %v26_v0  ;;  %85 = vmatpush.msra.mxu1 %v26_v0  ;;  %20 = vst.msk [vmem:[#allocation2 + $0x8] sm:$0xff] %vm18_vm0, %v91_v2  ;;  %v23_v4 = vld [vmem:[%s145_s1] sm:$0xff]  ;;  %v22_v6 = vld [vmem:[%s147_s0 + $0x8] sm:$0xff] }
   0x3   :  { %v21_v5 = vld [vmem:[%s147_s0] sm:$0xff] }
   0x4   :  { %49 = vmatpush.msra.mxu0 %v25_v1  ;;  %86 = vmatpush.msra.mxu1 %v25_v1  ;;  %v90_v13 = vld [vmem:[%s146_s2] ss:$0 sm:$0xff] }
   0x6   :  { %50 = vmatpush.msra.mxu0 %v24_v3  ;;  %87 = vmatpush.msra.mxu1 %v24_v3 }
   0x8   :  { %51 = vmatpush.msra.mxu0 %v23_v4  ;;  %88 = vmatpush.msra.mxu1 %v23_v4  ;;  %v27_v7 = vld [vmem:[#allocation2] sm:$0xff] }
   0x9   :  { %83 = vmatmul.msk.f32.vlgmr.msra.gmra.mxu0 %vm29_vm1, %v21_v5  ;;  %84 = vmatmul.msk.f32.vlgmr.msra.gmra.mxu1 %vm29_vm1, %v22_v6  ;;  %v28_v8 = vld [vmem:[#allocation2 + $0x8] sm:$0xff] }
  0x86   :  { %v53_v9 = vpop.f32.mrf.mxu0  ;;  %v56_v10 = vpop.f32.mrf.mxu1 }
  0x87   :  { %v59_v11 = vadd.f32 %v53_v9, %v27_v7  ;;  %v60_v12 = vadd.f32 %v56_v10, %v28_v8 }
  0x89   :  { %62 = vst.msk [vmem:[#allocation2] sm:$0xff] %vm18_vm0, %v59_v11 }
  0x8a   :  { %63 = vst.msk [vmem:[#allocation2 + $0x8] sm:$0xff] %vm18_vm0, %v60_v12 }
  0x90   :  { %v67_v14 = vld [vmem:[#allocation2] sm:$0xff] }
  0x91   :  { %v73_v15 = vadd.f32 %v90_v13, %v67_v14  ;;  %v68_v16 = vld [vmem:[#allocation2 + $0x8] sm:$0xff] }
  0x92   :  { %v74_v17 = vadd.f32 %v90_v13, %v68_v16 }
  0x93   :  { %v75_v18 = vmax.f32 %v73_v15, 0.0 }
  0x94   :  { %v76_v19 = vmax.f32 %v74_v17, 0.0 }
  0x95   :  { %77 = vst.msk [vmem:[%s148_s3] sm:$0xff] %vm18_vm0, %v75_v18 }
  0x96   :  { %78 = vst.msk [vmem:[%s148_s3 + $0x8] sm:$0xff] %vm18_vm0, %v76_v19 }

// kernel: ortho_linear_transformer.14
= control target key start
LH: loop header
LB: loop body
LE: loop exit
PB: predicated region body
PF: predicated region fallthrough
CT: control target
= control target key end

     0   :  { %vm18_vm0 = vcmask 261120   ;;  %v97_v2 = vmov 0.0   ;;  %vm33_vm1 = vcmask 523264   ;;  %s163_s1 = inlined_call_operand.vmem [shape: f32[64,32], index: 1, kind: input, shape index: {}]   ;;  %s164_s2 = inlined_call_operand.vmem [shape: f32[1,32], index: 2, kind: input, shape index: {}]   ;;  %s165_s0 = inlined_call_operand.vmem [shape: f32[16,64], index: 0, kind: input, shape index: {}]   ;;  %s166_s3 = inlined_call_operand.vmem [shape: f32[16,32], index: 3, kind: output, shape index: {}]  }
   0x1   :  { %v30_v0 = vld [vmem:[%s163_s1 + $0x38] sm:$0xff]  ;;  %v29_v1 = vld [vmem:[%s163_s1 + $0x30] sm:$0xff]  ;;  %19 = vst.msk [vmem:[#allocation2] sm:$0xff] %vm18_vm0, %v97_v2  ;;  %v28_v3 = vld [vmem:[%s163_s1 + $0x28] sm:$0xff] }
   0x2   :  { %48 = vmatpush.msra.mxu0 %v30_v0  ;;  %87 = vmatpush.msra.mxu1 %v30_v0  ;;  %20 = vst.msk [vmem:[#allocation2 + $0x8] sm:$0xff] %vm18_vm0, %v97_v2  ;;  %v27_v4 = vld [vmem:[%s163_s1 + $0x20] sm:$0xff]  ;;  %v26_v5 = vld [vmem:[%s163_s1 + $0x18] sm:$0xff]  ;;  %v25_v6 = vld [vmem:[%s163_s1 + $0x10] sm:$0xff] }
   0x3   :  { %v24_v7 = vld [vmem:[%s163_s1 + $0x8] sm:$0xff]  ;;  %v23_v8 = vld [vmem:[%s163_s1] sm:$0xff] }
   0x4   :  { %49 = vmatpush.msra.mxu0 %v29_v1  ;;  %88 = vmatpush.msra.mxu1 %v29_v1  ;;  %v21_v9 = vld [vmem:[%s165_s0] sm:$0xff]  ;;  %v22_v10 = vld [vmem:[%s165_s0 + $0x8] sm:$0xff] }
   0x5   :  { %v96_v17 = vld [vmem:[%s164_s2] ss:$0 sm:$0xff] }
   0x6   :  { %50 = vmatpush.msra.mxu0 %v28_v3  ;;  %89 = vmatpush.msra.mxu1 %v28_v3 }
   0x8   :  { %51 = vmatpush.msra.mxu0 %v27_v4  ;;  %90 = vmatpush.msra.mxu1 %v27_v4  ;;  %v31_v11 = vld [vmem:[#allocation2] sm:$0xff] }
   0x9   :  { %v32_v12 = vld [vmem:[#allocation2 + $0x8] sm:$0xff] }
   0xa   :  { %52 = vmatpush.msra.mxu0 %v26_v5  ;;  %91 = vmatpush.msra.mxu1 %v26_v5 }
   0xc   :  { %53 = vmatpush.msra.mxu0 %v25_v6  ;;  %92 = vmatpush.msra.mxu1 %v25_v6 }
   0xe   :  { %54 = vmatpush.msra.mxu0 %v24_v7  ;;  %93 = vmatpush.msra.mxu1 %v24_v7 }
  0x10   :  { %55 = vmatpush.msra.mxu0 %v23_v8  ;;  %94 = vmatpush.msra.mxu1 %v23_v8 }
  0x11   :  { %85 = vmatmul.msk.f32.vlgmr.msra.gmra.mxu0 %vm33_vm1, %v21_v9  ;;  %86 = vmatmul.msk.f32.vlgmr.msra.gmra.mxu1 %vm33_vm1, %v22_v10 }
  0x8e   :  { %v57_v13 = vpop.f32.mrf.mxu0  ;;  %v60_v14 = vpop.f32.mrf.mxu1 }
  0x8f   :  { %v63_v15 = vadd.f32 %v57_v13, %v31_v11  ;;  %v64_v16 = vadd.f32 %v60_v14, %v32_v12 }
  0x91   :  { %66 = vst.msk [vmem:[#allocation2] sm:$0xff] %vm18_vm0, %v63_v15 }
  0x92   :  { %67 = vst.msk [vmem:[#allocation2 + $0x8] sm:$0xff] %vm18_vm0, %v64_v16 }
  0x98   :  { %v71_v18 = vld [vmem:[#allocation2] sm:$0xff] }
  0x99   :  { %v77_v19 = vadd.f32 %v96_v17, %v71_v18  ;;  %v72_v20 = vld [vmem:[#allocation2 + $0x8] sm:$0xff] }
  0x9a   :  { %v78_v21 = vadd.f32 %v96_v17, %v72_v20 }
  0x9b   :  { %79 = vst.msk [vmem:[%s166_s3] sm:$0xff] %vm18_vm0, %v77_v19 }
  0x9c   :  { %80 = vst.msk [vmem:[%s166_s3 + $0x8] sm:$0xff] %vm18_vm0, %v78_v21 }

// kernel: ortho_linear_transformer.11
= control target key start
LH: loop header
LB: loop body
LE: loop exit
PB: predicated region body
PF: predicated region fallthrough
CT: control target
= control target key end

     0   :  { %s1531_s9 = smov 0   ;;  %s1533_s10 = smov 0   ;;  %s1796_s0 = inlined_call_operand.vmem [shape: f32[2,8,96], index: 0, kind: input, shape index: {}]   ;;  %s1797_s1 = inlined_call_operand.vmem [shape: f32[8,8], index: 1, kind: input, shape index: {}]   ;;  %s1798_s2 = inlined_call_operand.vmem [shape: f32[2,8,32], index: 2, kind: output, shape index: {}]  }
   0x1   :  { %s1535_s11 = smov 0  }
   0x2 LB: > { %s24_s12 = sadd.s32 1, %s1492_s10  ;;  %p1347_p0 = scmp.ge.s32.totalorder %s1496_s11, 1  ;;  %s1496_s11 = sphi %s1535_s11, %s12_s11   ;;  %s1492_s10 = sphi %s1533_s10, %s1800_s10   ;;  %s1488_s9 = sphi %s1531_s9, %s1799_s9  }
   0x3   : > { %p26_p1 = scmp.ge.s32.totalorder %s24_s12, 2  ;;  %p139_p2 = scmp.lt.s32.totalorder %s1496_s11, 3 }
   0x5   : > { %s1802_s12 = smov (%p26_p1, %s24_s12), 0  ;;  %p140_p3 = pnand %p1347_p0, %p139_p2 }
   0x6   : > { %p169_p4 = scmp.lt.s32.totalorder (!%p140_p3), %s1488_s9, 1  ;;  %s1498_s17 = smov (!%p140_p3), 96  }
   0x7   : > { %143 = sbr.rel (%p140_p3) target bundleno = 3155 (0xc53), region = 28  ;;  %s1500_s20 = smov (!%p140_p3), 124  }
   0x8   : > { %s1501_s21 = smov (!%p140_p3), 32   ;;  %s1502_s22 = smov (!%p140_p3), 120  }
   0x9   : > { %s1503_s23 = smov (!%p140_p3), 88   ;;  %s1504_s24 = smov (!%p140_p3), 8  }
   0xa   : > { %s1505_s25 = smov (!%p140_p3), 40   ;;  %s1506_s26 = smov (!%p140_p3), 64  }
   0xb   : > { %s1507_s27 = smov (!%p140_p3), 80   ;;  %s1508_s28 = smov (!%p140_p3), 112  }
   0xc   : > { %v197_v0 = vlaneseq  ;;  %s1804_s9 = smov (!%p169_p4, %s1488_s9), 1  ;;  %v1499_v7 = vmov 0.0   ;;  %vm231_vm6 = vcmask 1043456   ;;  %vm227_vm7 = vcmask 31744   ;;  %v1577_v11 = vld [vmem:[%s1797_s1] sm:$0xff]  ;;  %s1509_s29 = smov 48  }
   0xd   : > { %s1348_s13 = sshll.u32 %s1804_s9, 3  ;;  %277 = vrot.lane.b32.xlu1 %v1577_v11, %s1501_s21  ;;  %vm262_vm8 = vcmask 64512   ;;  %vm191_vm9 = vcmask 72704   ;;  %s1510_s30 = smov 16   ;;  %vm1246_vm11 = vcmask 130048   ;;  %vm1248_vm12 = vcmask 195584  }
   0xe   : > { %v1551_v1 = vshrl.u32 %v197_v0, 7  ;;  %v1553_v2 = vand.u32 127, %v197_v0  ;;  %s175_s16 = scalar_lea.vmem %s1796_s0, %s1348_s13  ;;  %192 = vst.msk [vmem:[#allocation2] sm:$0xff] %vm191_vm9, %v1499_v7  ;;  %s1511_s3 = smov 56   ;;  %vm1250_vm13 = vcmask 261120  }
   0xf   : > { %v1564_v6 = vld [vmem:[%s175_s16] sm:$0xff]  ;;  %193 = vst.msk [vmem:[#allocation2 + $0x8] sm:$0xff] %vm191_vm9, %v1499_v7  ;;  %s1512_s4 = smov 72   ;;  %s1513_s5 = smov 104  }
  0x10   : > { %v205_v3 = vand.u32 1, %v1551_v1  ;;  %v214_v4 = vadd.s32 1, %v1551_v1  ;;  %v1350_v5 = vadd.s32 4294967295, %v1551_v1  ;;  %281 = vrot.lane.b32.xlu0 %v1564_v6, %s1498_s17  ;;  %v226_v14 = vmul.f32 %v1564_v6, %v1577_v11  ;;  %194 = vst.msk [vmem:[#allocation2 + $0x10] sm:$0xff] %vm191_vm9, %v1499_v7  ;;  %s1514_s6 = smov 24   ;;  %s186_s14 = scalar_lea.vmem %s1798_s2, %s1348_s13 }
  0x11   : > { %195 = vst.msk [vmem:[#allocation2 + $0x18] sm:$0xff] %vm191_vm9, %v1499_v7  ;;  %vm224_vm10 = vcmp.le.s32.totalorder %v1553_v2, %v1551_v1 }
  0x12   : > { %vm213_vm0 = vcmp.eq.s32.totalorder %v205_v3, 0  ;;  %vm215_vm1 = vcmp.eq.s32.totalorder %v1553_v2, %v214_v4  ;;  %vm218_vm2 = vcmp.eq.s32.totalorder %v205_v3, 1  ;;  %vm220_vm3 = vcmp.eq.s32.totalorder %v1553_v2, %v1350_v5 }
  0x13   : > { %vm216_vm4 = vmand %vm213_vm0, %vm215_vm1 }
  0x14   : > { %v217_v8 = vsel %vm216_vm4, 1.0, %v1499_v7  ;;  %vm221_vm5 = vmand %vm218_vm2, %vm220_vm3 }
  0x15   : > { %v222_v9 = vsel %vm221_vm5, 1.0, %v1499_v7  ;;  %v1608_v34 = vld [vmem:[#allocation2] sm:$0xff] }
  0x16   : > { %v1570_v10 = vsub.f32 %v217_v8, %v222_v9  ;;  %378 = vmatpush.msra.mxu3 %v1608_v34 }
  0x18   : > { %1351 = vmatpush.msk.msra.mxu0 %vm231_vm6, %v1570_v10  ;;  %1353 = vmatpush.msk.msra.mxu1 %vm231_vm6, %v1570_v10 }
  0x19   : > { %1352 = vmatmul.msk.f32.vlgmr.msra.gmra.mxu0 %vm227_vm7, %v1564_v6  ;;  %256 = vrot.lane.b32.xlu0 %v1577_v11, %s1500_s20 }
  0x1a   : > { %1360 = vmatpush.msk.msrb.mxu3 %vm231_vm6, %v1570_v10 }
  0x7f   : > { %v278_v22 = vpop.permute.xlu1 %277 }
  0x80   : > { %v280_v23 = vmul.f32 %v278_v22, %v1564_v6 }
  0x82   : > { %v282_v12 = vpop.permute.xlu0 %281 }
  0x83   : > { %1354 = vmatmul.msk.f32.vlgmr.msra.gmra.mxu1 %vm227_vm7, %v282_v12 }
  0x8b   : > { %v1586_v13 = vpop.permute.xlu0 %256 }
  0x96   : > { %v252_v15 = vpop.f32.mrf.mxu0 }
  0x97   : > { %v259_v16 = vmul.f32 %v1586_v13, %v252_v15 }
  0x99   : > { %v260_v17 = vadd.f32 %v259_v16, %v226_v14 }
  0x9b   : > { %v261_v18 = vsel %vm227_vm7, %v260_v17, %v1564_v6 }
  0x9c   : > { %v263_v19 = vsel %vm262_vm8, %v261_v18, -inf }
  0x9d   : > { %264 = vmax.xlane.f32.xlu0 %v263_v19 }
  0xb1   : > { %480 = vrot.lane.b32.xlu0 %v1564_v6, %s1502_s22 }
 0x100   : > { %v302_v20 = vpop.f32.mrf.mxu1 }
 0x101   : > { %v305_v21 = vmul.f32 %v302_v20, %v1586_v13 }
 0x103   : > { %307 = vrot.lane.b32.xlu1 %v305_v21, %s1501_s21 }
 0x110   : > { %v265_v26 = vpop.xlane.xlu0 %264 }
 0x111   : > { %v266_v27 = vsub.f32 %v261_v18, %v265_v26 }
 0x113   : > { %v267_v28 = vmul.f32 1.442695, %v266_v27 }
 0x115   : > { %1434 = vpow2.f32 %v267_v28 }
 0x11b   : > { %v1435_v32 = vpop.eup %1434 }
 0x11c   : > { %v269_v33 = vsel %vm262_vm8, %v1435_v32, 0.0 }
 0x123   : > { %v481_v46 = vpop.permute.xlu0 %480 }
 0x175   : > { %v308_v24 = vpop.permute.xlu1 %307 }
 0x176   : > { %v310_v25 = vadd.f32 %v308_v24, %v280_v23 }
 0x178   : > { %312 = vrot.lane.b32.xlu2 %v310_v25, %s1498_s17 }
 0x1d2   : > { %v313_v29 = vpop.permute.xlu2 %312 }
 0x1d3   : > { %v316_v30 = vsel %vm227_vm7, %v313_v29, %v282_v12 }
 0x1d4   : > { %v317_v31 = vsel %vm262_vm8, %v316_v30, -inf }
 0x1d5   : > { %318 = vmax.xlane.f32.xlu2 %v317_v31 }
 0x1dd   : > { %270 = vadd.xlane.f32.xlu2 %v269_v33 }
 0x1f5   : > { %534 = vrot.lane.b32.xlu2 %v1564_v6, %s1503_s23 }
 0x1fd   : > { %475 = vrot.lane.b32.xlu2 %v1577_v11, %s1504_s24 }
 0x248   : > { %v319_v35 = vpop.xlane.xlu2 %318 }
 0x249   : > { %v320_v36 = vsub.f32 %v316_v30, %v319_v35  ;;  %v1652_v30 = vld [vmem:[#allocation2 + $0x8] sm:$0xff] }
 0x24b   : > { %v321_v37 = vmul.f32 1.442695, %v320_v36 }
 0x24d   : > { %1436 = vpow2.f32 %v321_v37 }
 0x250   : > { %v271_v38 = vpop.xlane.xlu2 %270 }
 0x251   : > { %1438 = vrcp.f32 %v271_v38 }
 0x253   : > { %v1437_v39 = vpop.eup %1436 }
 0x254   : > { %v323_v40 = vsel %vm262_vm8, %v1437_v39, 0.0 }
 0x255   : > { %324 = vadd.xlane.f32.xlu1 %v323_v40 }
 0x257   : > { %v1439_v41 = vpop.eup %1438 }
 0x258   : > { %v273_v42 = vmul.f32 %v1439_v41, %v271_v38  ;;  %v535_v53 = vpop.permute.xlu2 %534 }
 0x25a   : > { %v274_v43 = vsub.f32 2.0, %v273_v42 }
 0x25c   : > { %v275_v44 = vmul.f32 %v1439_v41, %v274_v43 }
 0x25e   : > { %v276_v45 = vmul.f32 %v1435_v32, %v275_v44 }
 0x260   : > { %1357 = vmatmul.msk.f32.vlgmr.msra.gmra.mxu3 %vm262_vm8, %v276_v45  ;;  %v476_v58 = vpop.permute.xlu2 %475 }
 0x261   : > { %v478_v59 = vmul.f32 %v476_v58, %v1564_v6 }
 0x268   : > { %1361 = vmatmul.msk.f32.vlgmr.msrb.gmra.mxu3 %vm227_vm7, %v481_v46 }
 0x26e   : > { %530 = vrot.lane.b32.xlu1 %v1577_v11, %s1505_s25 }
 0x2c8   : > { %v325_v47 = vpop.xlane.xlu1 %324 }
 0x2c9   : > { %1440 = vrcp.f32 %v325_v47 }
 0x2cf   : > { %v1441_v48 = vpop.eup %1440 }
 0x2d0   : > { %v327_v49 = vmul.f32 %v1441_v48, %v325_v47 }
 0x2d2   : > { %v328_v50 = vsub.f32 2.0, %v327_v49 }
 0x2d4   : > { %v329_v51 = vmul.f32 %v1441_v48, %v328_v50 }
 0x2d6   : > { %v330_v52 = vmul.f32 %v1437_v39, %v329_v51 }
 0x2d8   : > { %1355 = vmatpush.xpose.msk.msra.mxu2 %vm262_vm8, %v330_v52 }
 0x2db   : > { %1356 = vmatmul.msk.f32.vlgmr.msra.gmra.mxu2 %vm262_vm8, %v276_v45 }
 0x2dc   : > { %1362 = vmatpush.msk.msrb.mxu2 %vm231_vm6, %v1570_v10 }
 0x2e0   : > { %v531_v57 = vpop.permute.xlu1 %530 }
 0x2e1   : > { %v533_v3 = vmul.f32 %v531_v57, %v1564_v6 }
 0x2e3   : > { %v1624_v54 = vpop.f32.mrf.mxu3  ;;  %1363 = vmatmul.msk.f32.vlgmr.msrb.gmra.mxu2 %vm227_vm7, %v535_v53 }
 0x2eb   : > { %v501_v55 = vpop.f32.mrf.mxu3 }
 0x2ec   : > { %v504_v56 = vmul.f32 %v501_v55, %v1586_v13 }
 0x2ee   : > { %506 = vrot.lane.b32.xlu1 %v504_v56, %s1504_s24 }
 0x35e   : > { %v359_v60 = vpop.f32.mrf.mxu2 }
 0x35f   : > { %v362_v23 = vsel %vm224_vm10, %v359_v60, 0.0 }
 0x360   : > { %v507_v61 = vpop.permute.xlu1 %506 }
 0x361   : > { %v509_v62 = vadd.f32 %v507_v61, %v478_v59 }
 0x363   : > { %511 = vrot.lane.b32.xlu2 %v509_v62, %s1502_s22 }
 0x366   : > { %v555_v63 = vpop.f32.mrf.mxu2 }
 0x367   : > { %v558_v0 = vmul.f32 %v555_v63, %v1586_v13 }
 0x369   : > { %560 = vrot.lane.b32.xlu0 %v558_v0, %s1505_s25 }
 0x3bd   : > { %v512_v7 = vpop.permute.xlu2 %511 }
 0x3be   : > { %v515_v8 = vsel %vm227_vm7, %v512_v7, %v481_v46 }
 0x3bf   : > { %v516_v9 = vsel %vm262_vm8, %v515_v8, -inf }
 0x3db   : > { %v561_v4 = vpop.permute.xlu0 %560 }
 0x3dc   : > { %v563_v5 = vadd.f32 %v561_v4, %v533_v3 }
 0x3de   : > { %565 = vrot.lane.b32.xlu0 %v563_v5, %s1503_s23 }
 0x408   : > { %517 = vmax.xlane.f32.xlu0 %v516_v9 }
 0x41c   : > { %331 = vrot.lane.b32.xlu0 %v1564_v6, %s1506_s26 }
 0x43e   : > { %406 = vxpose.xlu0.b32.start.end [1/1] (short) (narrow) %v330_v52, 8 }
 0x450   : > { %v566_v12 = vpop.permute.xlu0 %565 }
 0x451   : > { %v569_v14 = vsel %vm227_vm7, %v566_v12, %v535_v53 }
 0x452   : > { %v570_v15 = vsel %vm262_vm8, %v569_v14, -inf }
 0x453   : > { %571 = vmax.xlane.f32.xlu1 %v570_v15 }
 0x47b   : > { %v518_v16 = vpop.xlane.xlu0 %517 }
 0x47c   : > { %v519_v17 = vsub.f32 %v515_v8, %v518_v16 }
 0x47e   : > { %v520_v18 = vmul.f32 1.442695, %v519_v17 }
 0x480   : > { %1442 = vpow2.f32 %v520_v18 }
 0x486   : > { %v1443_v19 = vpop.eup %1442 }
 0x487   : > { %v522_v20 = vsel %vm262_vm8, %v1443_v19, 0.0 }
 0x488   : > { %523 = vadd.xlane.f32.xlu1 %v522_v20 }
 0x48e   : > { %v332_v21 = vpop.permute.xlu0 %331 }
 0x48f   : > { %v334_v22 = vsel %vm262_vm8, %v332_v21, 1.0 }
 0x490   : > { %401 = vmatpush.msrb.mxu0 %v334_v22  ;;  %456 = vmatpush.msrb.mxu1 %v334_v22 }
 0x491   : > { %1358 = vmatmul.msk.f32.vlgmr.msrb.gmra.mxu0 %vm262_vm8, %v362_v23 }
 0x492   : > { %632 = vmatpush.msra.mxu1 %v1652_v30 }
 0x4a1   : > { %787 = vrot.lane.b32.xlu1 %v1564_v6, %s1507_s27 }
 0x4a9   : > { %783 = vrot.lane.b32.xlu1 %v1577_v11, %s1509_s29 }
 0x4c6   : > { %v572_v24 = vpop.xlane.xlu1 %571 }
 0x4c7   : > { %v573_v25 = vsub.f32 %v569_v14, %v572_v24 }
 0x4c9   : > { %v574_v26 = vmul.f32 1.442695, %v573_v25 }
 0x4cb   : > { %1444 = vpow2.f32 %v574_v26 }
 0x4d1   : > { %v1445_v27 = vpop.eup %1444 }
 0x4d2   : > { %v576_v28 = vsel %vm262_vm8, %v1445_v27, 0.0 }
 0x4d3   : > { %577 = vadd.xlane.f32.xlu2 %v576_v28 }
 0x4e2   : > { %v422_v29 = vpop.trf.xlu0 }
 0x4e3   : > { %1359 = vmatmul.msk.f32.vlgmr.msrb.gmra.mxu1 %vm262_vm8, %v422_v29 }
 0x4e4   : > { %1371 = vmatpush.msk.msrb.mxu1 %vm231_vm6, %v1570_v10 }
 0x4eb   : > { %733 = vrot.lane.b32.xlu2 %v1564_v6, %s1508_s28 }
 0x4f3   : > { %728 = vrot.lane.b32.xlu2 %v1577_v11, %s1510_s30 }
 0x4fb   : > { %v524_v31 = vpop.xlane.xlu1 %523 }
 0x4fc   : > { %1446 = vrcp.f32 %v524_v31 }
 0x502   : > { %v1447_v32 = vpop.eup %1446 }
 0x503   : > { %v526_v33 = vmul.f32 %v1447_v32, %v524_v31 }
 0x505   : > { %v527_v35 = vsub.f32 2.0, %v526_v33 }
 0x507   : > { %v528_v36 = vmul.f32 %v1447_v32, %v527_v35 }
 0x509   : > { %v529_v37 = vmul.f32 %v1443_v19, %v528_v36 }
 0x50b   : > { %1366 = vmatmul.msk.f32.vlgmr.msra.gmra.mxu1 %vm262_vm8, %v529_v37 }
 0x50e   : > { %v1679_v51 = vpop.f32.mrf.mxu0 }
 0x513   : > { %v788_v38 = vpop.permute.xlu1 %787 }
 0x514   : > { %1372 = vmatmul.msk.f32.vlgmr.msrb.gmra.mxu1 %vm227_vm7, %v788_v38 }
 0x51b   : > { %v784_v56 = vpop.permute.xlu1 %783 }
 0x546   : > { %v578_v39 = vpop.xlane.xlu2 %577 }
 0x547   : > { %1448 = vrcp.f32 %v578_v39 }
 0x54d   : > { %v1449_v40 = vpop.eup %1448 }
 0x54e   : > { %v580_v41 = vmul.f32 %v1449_v40, %v578_v39  ;;  %v734_v45 = vpop.permute.xlu2 %733  ;;  %v1715_v39 = vld [vmem:[#allocation2 + $0x10] sm:$0xff] }
 0x550   : > { %v581_v42 = vsub.f32 2.0, %v580_v41 }
 0x552   : > { %v582_v43 = vmul.f32 %v1449_v40, %v581_v42 }
 0x554   : > { %v1663_v44 = vmul.f32 %v1445_v27, %v582_v43 }
 0x556   : > { %1364 = vmatpush.xpose.msk.msra.mxu0 %vm262_vm8, %v1663_v44  ;;  %v729_v59 = vpop.permute.xlu2 %728 }
 0x557   : > { %v731_v60 = vmul.f32 %v729_v59, %v1564_v6 }
 0x559   : > { %1365 = vmatmul.msk.f32.vlgmr.msra.gmra.mxu0 %vm262_vm8, %v529_v37 }
 0x55a   : > { %1369 = vmatpush.msk.msrb.mxu0 %vm231_vm6, %v1570_v10 }
 0x560   : > { %v458_v46 = vpop.f32.mrf.mxu1 }
 0x561   : > { %1370 = vmatmul.msk.f32.vlgmr.msrb.gmra.mxu0 %vm227_vm7, %v734_v45  ;;  %v461_v47 = vadd.f32 %v458_v46, %v1608_v34  ;;  %v786_v34 = vmul.f32 %v784_v56, %v1564_v6 }
 0x563   : > { %463 = vst.msk [vmem:[#allocation2] sm:$0xff] %vm191_vm9, %v461_v47 }
 0x588   : > { %v1675_v48 = vpop.f32.mrf.mxu1 }
 0x591   : > { %v808_v49 = vpop.f32.mrf.mxu1 }
 0x592   : > { %v811_v50 = vmul.f32 %v808_v49, %v1586_v13 }
 0x594   : > { %813 = vrot.lane.b32.xlu1 %v811_v50, %s1509_s29 }
 0x5d6   : > { %v613_v52 = vpop.f32.mrf.mxu0 }
 0x5d7   : > { %v616_v7 = vsel %vm224_vm10, %v613_v52, 0.0  ;;  %v1515_v52 = vmov 8  }
 0x5d8   : > { %1431 = vset.pattern.permute.xlu0 %v1515_v52 }
 0x5de   : > { %v754_v53 = vpop.f32.mrf.mxu0 }
 0x5df   : > { %v757_v55 = vmul.f32 %v754_v53, %v1586_v13 }
 0x5e1   : > { %759 = vrot.lane.b32.xlu2 %v757_v55, %s1510_s30 }
 0x606   : > { %v814_v57 = vpop.permute.xlu1 %813 }
 0x607   : > { %v816_v58 = vadd.f32 %v814_v57, %v786_v34 }
 0x609   : > { %818 = vrot.lane.b32.xlu1 %v816_v58, %s1507_s27 }
 0x611   : > { %584 = vrot.lane.b32.xlu1 %v1564_v6, %s1511_s3 }
 0x63b   : > { %v760_v61 = vpop.permute.xlu2 %759 }
 0x63c   : > { %v762_v62 = vadd.f32 %v760_v61, %v731_v60 }
 0x63e   : > { %764 = vrot.lane.b32.xlu2 %v762_v62, %s1508_s28 }
 0x67b   : > { %v819_v63 = vpop.permute.xlu1 %818 }
 0x67c   : > { %v822_v0 = vsel %vm227_vm7, %v819_v63, %v788_v38 }
 0x67d   : > { %v823_v3 = vsel %vm262_vm8, %v822_v0, -inf }
 0x67e   : > { %824 = vmax.xlane.f32.xlu0 %v823_v3 }
 0x683   : > { %v585_v4 = vpop.permute.xlu1 %584 }
 0x684   : > { %v587_v5 = vsel %vm262_vm8, %v585_v4, 1.0 }
 0x685   : > { %655 = vmatpush.msra.mxu3 %v587_v5  ;;  %710 = vmatpush.msra.mxu2 %v587_v5 }
 0x686   : > { %1367 = vmatmul.msk.f32.vlgmr.msra.gmra.mxu3 %vm262_vm8, %v616_v7 }
 0x687   : > { %885 = vmatpush.msrb.mxu2 %v1715_v39 }
 0x698   : > { %v765_v8 = vpop.permute.xlu2 %764 }
 0x699   : > { %v768_v9 = vsel %vm227_vm7, %v765_v8, %v734_v45 }
 0x69a   : > { %v769_v12 = vsel %vm262_vm8, %v768_v9, -inf }
 0x69b   : > { %770 = vmax.xlane.f32.xlu2 %v769_v12 }
 0x6f1   : > { %v825_v14 = vpop.xlane.xlu0 %824 }
 0x6f2   : > { %v826_v15 = vsub.f32 %v822_v0, %v825_v14 }
 0x6f4   : > { %v827_v16 = vmul.f32 1.442695, %v826_v15 }
 0x6f6   : > { %1450 = vpow2.f32 %v827_v16 }
 0x6fc   : > { %v1451_v17 = vpop.eup %1450 }
 0x6fd   : > { %v829_v18 = vsel %vm262_vm8, %v1451_v17, 0.0 }
 0x6fe   : > { %830 = vadd.xlane.f32.xlu2 %v829_v18 }
 0x70e   : > { %v771_v19 = vpop.xlane.xlu2 %770 }
 0x70f   : > { %v772_v20 = vsub.f32 %v768_v9, %v771_v19 }
 0x711   : > { %v773_v21 = vmul.f32 1.442695, %v772_v20 }
 0x713   : > { %1452 = vpow2.f32 %v773_v21 }
 0x716   : > { %1040 = vrot.lane.b32.xlu2 %v1564_v6, %s1512_s4 }
 0x719   : > { %v1453_v22 = vpop.eup %1452 }
 0x71a   : > { %v775_v23 = vsel %vm262_vm8, %v1453_v22, 0.0 }
 0x71b   : > { %776 = vadd.xlane.f32.xlu1 %v775_v23 }
 0x734   : > { %986 = vrot.lane.b32.xlu1 %v1564_v6, %s1513_s5 }
 0x73c   : > { %660 = vxpose.xlu2.b32.start.end [1/1] (short) (narrow) %v1663_v44, 8  ;;  %1036 = vrot.lane.b32.xlu1 %v1577_v11, %s1511_s3  ;;  %v657_v44 = vpop.f32.mrf.mxu3 }
 0x73d   : > { %v658_v53 = vadd.f32 %v657_v44, %v1675_v48 }
 0x744   : > { %981 = vrot.lane.b32.xlu1 %v1577_v11, %s1514_s6 }
 0x771   : > { %v831_v24 = vpop.xlane.xlu2 %830 }
 0x772   : > { %1454 = vrcp.f32 %v831_v24 }
 0x778   : > { %v1455_v25 = vpop.eup %1454 }
 0x779   : > { %v833_v26 = vmul.f32 %v1455_v25, %v831_v24  ;;  %v1041_v40 = vpop.permute.xlu2 %1040 }
 0x77b   : > { %v834_v27 = vsub.f32 2.0, %v833_v26 }
 0x77d   : > { %v835_v28 = vmul.f32 %v1455_v25, %v834_v27 }
 0x77f   : > { %v1707_v29 = vmul.f32 %v1451_v17, %v835_v28 }
 0x781   : > { %1373 = vmatpush.xpose.msk.msrb.mxu3 %vm262_vm8, %v1707_v29 }
 0x785   : > { %1378 = vmatpush.msk.msra.mxu3 %vm231_vm6, %v1570_v10 }
 0x78e   : > { %v777_v31 = vpop.xlane.xlu1 %776 }
 0x78f   : > { %1456 = vrcp.f32 %v777_v31 }
 0x790   : > { %1458 = vrcp.f32 %v658_v53 }
 0x795   : > { %v1457_v32 = vpop.eup %1456 }
 0x796   : > { %v779_v33 = vmul.f32 %v1457_v32, %v777_v31  ;;  %v1459_v57 = vpop.eup %1458 }
 0x797   : > { %v718_v59 = vmul.f32 %v1459_v57, %v658_v53 }
 0x798   : > { %v780_v35 = vsub.f32 2.0, %v779_v33 }
 0x799   : > { %v719_v61 = vsub.f32 2.0, %v718_v59 }
 0x79a   : > { %v781_v36 = vmul.f32 %v1457_v32, %v780_v35 }
 0x79b   : > { %v720_v62 = vmul.f32 %v1459_v57, %v719_v61 }
 0x79c   : > { %v782_v37 = vmul.f32 %v1453_v22, %v781_v36  ;;  %v1750_v22 = vadd.f32 %v1679_v51, %v1624_v54 }
 0x79e   : > { %1374 = vmatmul.msk.f32.vlgmr.msrb.gmra.mxu3 %vm262_vm8, %v782_v37  ;;  %1432 = vset.pattern.permute.xlu2 %v1515_v52 }
 0x7a6   : > { %v987_v38 = vpop.permute.xlu1 %986 }
 0x7a7   : > { %1379 = vmatmul.msk.f32.vlgmr.msra.gmra.mxu3 %vm227_vm7, %v987_v38 }
 0x7ae   : > { %v1037_v50 = vpop.permute.xlu1 %1036 }
 0x7af   : > { %v1039_v55 = vmul.f32 %v1037_v50, %v1564_v6 }
 0x7d5   : > { %v676_v41 = vpop.trf.xlu2 }
 0x7d6   : > { %1368 = vmatmul.msk.f32.vlgmr.msra.gmra.mxu2 %vm262_vm8, %v676_v41 }
 0x7d7   : > { %1380 = vmatpush.msk.msra.mxu2 %vm231_vm6, %v1570_v10 }
 0x7de   : > { %1375 = vmatmul.msk.f32.vlgmr.msrb.gmra.mxu2 %vm262_vm8, %v782_v37 }
 0x7e6   : > { %1381 = vmatmul.msk.f32.vlgmr.msra.gmra.mxu2 %vm227_vm7, %v1041_v40 }
 0x821   : > { %v1729_v46 = vpop.f32.mrf.mxu3 }
 0x822   : > { %v869_v41 = vsel %vm224_vm10, %v1729_v46, 0.0 }
 0x82a   : > { %v1007_v49 = vpop.f32.mrf.mxu3 }
 0x82b   : > { %v1010_v11 = vmul.f32 %v1007_v49, %v1586_v13 }
 0x859   : > { %v712_v42 = vpop.f32.mrf.mxu2 }
 0x85a   : > { %v715_v43 = vadd.f32 %v712_v42, %v1652_v30  ;;  %v982_v30 = vpop.permute.xlu1 %981 }
 0x85b   : > { %v984_v58 = vmul.f32 %v982_v30, %v1564_v6 }
 0x85c   : > { %716 = vst.msk [vmem:[#allocation2 + $0x8] sm:$0xff] %vm191_vm9, %v715_v43 }
 0x861   : > { %v1727_v45 = vpop.f32.mrf.mxu2 }
 0x869   : > { %v1061_v47 = vpop.f32.mrf.mxu2 }
 0x86a   : > { %v1064_v10 = vmul.f32 %v1061_v47, %v1586_v13 }
 0x86c   : > { %1066 = vrot.lane.b32.xlu1 %v1064_v10, %s1511_s3 }
 0x874   : > { %1012 = vrot.lane.b32.xlu1 %v1010_v11, %s1514_s6 }
 0x8de   : > { %v1067_v56 = vpop.permute.xlu1 %1066 }
 0x8df   : > { %v1069_v34 = vadd.f32 %v1067_v56, %v1039_v55 }
 0x8e1   : > { %1071 = vrot.lane.b32.xlu1 %v1069_v34, %s1512_s4 }
 0x8e6   : > { %v1013_v13 = vpop.permute.xlu1 %1012 }
 0x8e7   : > { %v1015_v60 = vadd.f32 %v1013_v13, %v984_v58 }
 0x8e9   : > { %1017 = vrot.lane.b32.xlu2 %v1015_v60, %s1513_s5 }
 0x8f1   : > { %723 = vperm.xlu2 %1432, %v720_v62  }
 0x943   : > { %v1018_v63 = vpop.permute.xlu2 %1017 }
 0x944   : > { %v1021_v48 = vsel %vm227_vm7, %v1018_v63, %v987_v38 }
 0x945   : > { %v1022_v0 = vsel %vm262_vm8, %v1021_v48, -inf }
 0x946   : > { %1023 = vmax.xlane.f32.xlu1 %v1022_v0 }
 0x94b   : > { %v724_v3 = vpop.permute.xlu2 %723 }
 0x94c   : > { %v726_v4 = vmul.f32 %v724_v3, %v658_v53 }
 0x94e   : > { %1234 = vrot.lane.b32.xlu2 %v726_v4, %s1504_s24 }
 0x953   : > { %v1072_v5 = vpop.permute.xlu1 %1071 }
 0x954   : > { %v1075_v7 = vsel %vm227_vm7, %v1072_v5, %v1041_v40  ;;  %v1095_v40 = vld [vmem:[#allocation2 + $0x18] sm:$0xff] }
 0x955   : > { %v1076_v8 = vsel %vm262_vm8, %v1075_v7, -inf }
 0x956   : > { %1077 = vmax.xlane.f32.xlu0 %v1076_v8 }
 0x980   : > { %913 = vxpose.xlu1.b32.start.end [1/1] (short) (narrow) %v1707_v29, 8 }
 0x9a8   : > { %v1235_v3 = vpop.permute.xlu2 %1234 }
 0x9b9   : > { %v1024_v9 = vpop.xlane.xlu1 %1023 }
 0x9ba   : > { %v1025_v15 = vsub.f32 %v1021_v48, %v1024_v9 }
 0x9bc   : > { %v1026_v17 = vmul.f32 1.442695, %v1025_v15 }
 0x9c9   : > { %v1078_v12 = vpop.xlane.xlu0 %1077 }
 0x9ca   : > { %v1079_v14 = vsub.f32 %v1075_v7, %v1078_v12 }
 0x9cc   : > { %v1080_v16 = vmul.f32 1.442695, %v1079_v14 }
 0x9ce   : > { %1460 = vpow2.f32 %v1080_v16 }
 0x9cf   : > { %1462 = vpow2.f32 %v1026_v17 }
 0x9d0   : > { %1464 = vrcp.f32 %v1750_v22 }
 0x9d3   : > { %1433 = vset.pattern.permute.xlu1 %v1515_v52 }
 0x9d4   : > { %v1461_v18 = vpop.eup %1460 }
 0x9d5   : > { %v1082_v19 = vsel %vm262_vm8, %v1461_v18, 0.0  ;;  %v1463_v20 = vpop.eup %1462 }
 0x9d6   : > { %1083 = vadd.xlane.f32.xlu0 %v1082_v19  ;;  %v1028_v21 = vsel %vm262_vm8, %v1463_v20, 0.0  ;;  %v1465_v23 = vpop.eup %1464 }
 0x9d7   : > { %v465_v24 = vmul.f32 %v1465_v23, %v1750_v22 }
 0x9d9   : > { %v466_v25 = vsub.f32 2.0, %v465_v24 }
 0x9db   : > { %v467_v26 = vmul.f32 %v1465_v23, %v466_v25 }
 0x9de   : > { %1029 = vadd.xlane.f32.xlu0 %v1028_v21 }
 0x9f2   : > { %837 = vrot.lane.b32.xlu0 %v1564_v6, %s1509_s29 }
 0x9fa   : > { %1090 = vrot.lane.b32.xlu0 %v1564_v6, %s1505_s25 }
 0xa02   : > { %470 = vperm.xlu0 %1431, %v467_v26  }
 0xa24   : > { %v929_v37 = vpop.trf.xlu1 }
 0xa49   : > { %v1084_v27 = vpop.xlane.xlu0 %1083 }
 0xa4a   : > { %1466 = vrcp.f32 %v1084_v27 }
 0xa50   : > { %v1467_v28 = vpop.eup %1466 }
 0xa51   : > { %v1086_v29 = vmul.f32 %v1467_v28, %v1084_v27  ;;  %v1030_v31 = vpop.xlane.xlu0 %1029 }
 0xa52   : > { %1468 = vrcp.f32 %v1030_v31 }
 0xa53   : > { %v1087_v54 = vsub.f32 2.0, %v1086_v29 }
 0xa55   : > { %v1088_v51 = vmul.f32 %v1467_v28, %v1087_v54 }
 0xa57   : > { %v1089_v32 = vmul.f32 %v1461_v18, %v1088_v51 }
 0xa58   : > { %v1469_v33 = vpop.eup %1468 }
 0xa59   : > { %1166 = vxpose.xlu0.b32.start.end [1/1] (short) (narrow) %v1089_v32, 8  ;;  %v1032_v35 = vmul.f32 %v1469_v33, %v1030_v31 }
 0xa5b   : > { %v1033_v38 = vsub.f32 2.0, %v1032_v35 }
 0xa5d   : > { %v1034_v42 = vmul.f32 %v1469_v33, %v1033_v38 }
 0xa5f   : > { %v1035_v44 = vmul.f32 %v1463_v20, %v1034_v42 }
 0xa64   : > { %v838_v36 = vpop.permute.xlu0 %837 }
 0xa65   : > { %v840_v6 = vsel %vm262_vm8, %v838_v36, 1.0 }
 0xa66   : > { %908 = vmatpush.msra.mxu0 %v840_v6  ;;  %963 = vmatpush.msra.mxu1 %v840_v6 }
 0xa67   : > { %1376 = vmatmul.msk.f32.vlgmr.msra.gmra.mxu0 %vm262_vm8, %v869_v41  ;;  %1377 = vmatmul.msk.f32.vlgmr.msra.gmra.mxu1 %vm262_vm8, %v929_v37 }
 0xa68   : > { %1382 = vmatpush.xpose.msk.msrb.mxu0 %vm262_vm8, %v1089_v32  ;;  %1138 = vmatpush.msrb.mxu1 %v1095_v40 }
 0xa6c   : > { %v1091_v43 = vpop.permute.xlu0 %1090 }
 0xa6d   : > { %v1093_v47 = vsel %vm262_vm8, %v1091_v43, 1.0 }
 0xa6e   : > { %1161 = vmatpush.msrb.mxu3 %v1093_v47  ;;  %1216 = vmatpush.msrb.mxu2 %v1093_v47 }
 0xa6f   : > { %1383 = vmatmul.msk.f32.vlgmr.msrb.gmra.mxu0 %vm262_vm8, %v1035_v44  ;;  %1384 = vmatmul.msk.f32.vlgmr.msrb.gmra.mxu1 %vm262_vm8, %v1035_v44 }
 0xa74   : > { %v471_v34 = vpop.permute.xlu0 %470 }
 0xa75   : > { %v473_v5 = vmul.f32 %v471_v34, %v1750_v22 }
 0xa77   : > { %v1245_v7 = vsel %vm262_vm8, %v473_v5, %v1235_v3 }
 0xae4   : > { %v910_v46 = vpop.f32.mrf.mxu0  ;;  %v965_v10 = vpop.f32.mrf.mxu1 }
 0xae5   : > { %v911_v49 = vadd.f32 %v910_v46, %v1727_v45  ;;  %v968_v11 = vadd.f32 %v965_v10, %v1715_v39 }
 0xae7   : > { %1470 = vrcp.f32 %v911_v49  ;;  %969 = vst.msk [vmem:[#allocation2 + $0x10] sm:$0xff] %vm191_vm9, %v968_v11 }
 0xaec   : > { %v1119_v50 = vpop.f32.mrf.mxu0  ;;  %v1140_v58 = vpop.f32.mrf.mxu1 }
 0xaed   : > { %v1471_v52 = vpop.eup %1470  ;;  %v1122_v30 = vsel %vm224_vm10, %v1119_v50, 0.0 }
 0xaee   : > { %v971_v53 = vmul.f32 %v1471_v52, %v911_v49  ;;  %1385 = vmatmul.msk.f32.vlgmr.msrb.gmra.mxu3 %vm262_vm8, %v1122_v30 }
 0xaf0   : > { %v972_v55 = vsub.f32 2.0, %v971_v53 }
 0xaf2   : > { %v973_v56 = vmul.f32 %v1471_v52, %v972_v55 }
 0xaf4   : > { %976 = vperm.xlu0 %1431, %v973_v56  }
 0xafd   : > { %v1182_v57 = vpop.trf.xlu0 }
 0xafe   : > { %1386 = vmatmul.msk.f32.vlgmr.msrb.gmra.mxu2 %vm262_vm8, %v1182_v57 }
 0xb66   : > { %v977_v39 = vpop.permute.xlu0 %976 }
 0xb67   : > { %v979_v45 = vmul.f32 %v977_v39, %v911_v49 }
 0xb69   : > { %1238 = vrot.lane.b32.xlu2 %v979_v45, %s1510_s30 }
 0xb71   : > { %v1163_v13 = vpop.f32.mrf.mxu3 }
 0xb72   : > { %v1164_v59 = vadd.f32 %v1163_v13, %v1140_v58 }
 0xb74   : > { %1472 = vrcp.f32 %v1164_v59 }
 0xb7a   : > { %v1473_v1 = vpop.eup %1472 }
 0xb7b   : > { %v1224_v2 = vmul.f32 %v1473_v1, %v1164_v59 }
 0xb7d   : > { %v1225_v60 = vsub.f32 2.0, %v1224_v2 }
 0xb7f   : > { %v1226_v61 = vmul.f32 %v1473_v1, %v1225_v60 }
 0xb81   : > { %1229 = vperm.xlu1 %1433, %v1226_v61   ;;  %v1218_v48 = vpop.f32.mrf.mxu2 }
 0xb82   : > { %v1221_v0 = vadd.f32 %v1218_v48, %v1095_v40 }
 0xb84   : > { %1222 = vst.msk [vmem:[#allocation2 + $0x18] sm:$0xff] %vm191_vm9, %v1221_v0 }
 0xbc3   : > { %v1239_v4 = vpop.permute.xlu2 %1238 }
 0xbc4   : > { %v1247_v8 = vsel %vm1246_vm11, %v1245_v7, %v1239_v4 }
 0xbf3   : > { %v1230_v62 = vpop.permute.xlu1 %1229 }
 0xbf4   : > { %v1232_v63 = vmul.f32 %v1230_v62, %v1164_v59 }
 0xbf6   : > { %1242 = vrot.lane.b32.xlu2 %v1232_v63, %s1514_s6 }
 0xc50   : > { %v1243_v9 = vpop.permute.xlu2 %1242 }
 0xc51   : > { %v1249_v12 = vsel %vm1248_vm12, %v1247_v8, %v1243_v9 }
 0xc52   : > { %1251 = vst.msk [vmem:[%s186_s14] sm:$0xff] %vm1250_vm13, %v1249_v12 }
 0xc53 PF: > { %s12_s11 = sadd.s32 1, %s1496_s11   ;;  %s1799_s9 = smov %s1492_s10 }
 0xc54   : > { %p9_p5 = scmp.ge.s32.totalorder %s12_s11, 4   ;;  %s1800_s10 = smov %s1802_s12 }
 0xc56   :  { %11 = sbr.rel (!%p9_p5) target bundleno = 2 (0x2), region = 68 }

</bundles_post_ra>
